<compile_context>
chip_gen: v7x
topology: tpu7x:2x2x1
jax: 0.10.0
libtpu: 0.0.40
codegen_flags: <defaults>
</compile_context>

<pallas_src>
import functools

import jax
import jax.numpy as jnp
import numpy as np
from jax.experimental import pallas as pl
from jax.experimental.pallas import tpu as pltpu


def autopad(k, p=None):
    if p is None:
        p = k // 2 if isinstance(k, int) else [x // 2 for x in k]
    return p


def _vmem_capacity_bytes():
    """Per-core VMEM capacity; conservative default if the query is unavailable."""
    try:
        return int(pltpu.get_tpu_info().vmem_capacity_bytes)
    except Exception:
        return 64 * 1024 * 1024  # v7x per-TC size (worst case)


def _pick_row_tile(Ho, Wo, Wp, C1, C2p, K, S, itemsize, budget_bytes):
    """Largest divisor of Ho whose *real* per-step VMEM footprint fits the budget.

    Prefers MXU-aligned M = TH*Wo (multiple of 256, then 128, then 8).  The
    fallback never violates the (8,128) output-block constraint: either
    TH*Wo % 8 == 0 or TH == Ho (full dim).
    """
    LANE, SUB = 128, 8
    rup = lambda a, b: ((a + b - 1) // b) * b

    def footprint(th):
        th_in = (th - 1) * S + K
        m = th * Wo
        win = 2 * th_in * rup(Wp, SUB) * rup(C1, LANE) * itemsize      # dbl-buffered input window
        out = 2 * rup(m, SUB) * C2p * itemsize                         # dbl-buffered output tile
        acc = rup(m, SUB) * C2p * 4                                    # f32 accumulator
        opnd = rup(m, SUB) * rup(K * K * C1, LANE) * 4                 # im2col operand (worst case)
        w = rup(K * K * C1, SUB) * C2p * itemsize                      # single-buffered weights
        return win + out + acc + opnd + w

    divs = [d for d in range(1, Ho + 1) if Ho % d == 0]
    legal = [d for d in divs if (d * Wo) % 8 == 0 or d == Ho]

    for align in (256, 128, 8):
        cands = [d for d in legal if (d * Wo) % align == 0 and footprint(d) <= budget_bytes]
        if cands:
            return max(cands)
    fitting = [d for d in legal if footprint(d) <= budget_bytes]
    if fitting:
        return max(fitting)
    return min(legal, key=footprint)  # guard: smallest footprint rather than blowing VMEM


def _conv_bn_silu_kernel(x_ref, w_ref, shift_ref, o_ref, *, K, S, TH, Wo, C1, concat_path):
    """One grid step == one (batch, output-row-tile) pair.

    x_ref:     (TH_in, Wp, C1)   streamed halo'd input row window
    w_ref:     (K*K*C1, C2p)     BN-scale-folded, channel-padded weights (single-buffered)
    shift_ref: (1, C2p)          folded BN shift, f32 (zero in padded channels)
    o_ref:     (TH*Wo, C2p)      lane-dense output tile (rows flattened)
    """
    M = TH * Wo
    C2p = o_ref.shape[-1]

    def window(kh, kw):
        # Slice the (kh, kw) shifted window directly from the ref (no whole-window
        # materialization in vregs); strided load handles s > 1.
        if S == 1:
            win = x_ref[pl.ds(kh, TH), pl.ds(kw, Wo), :]
        else:
            win = x_ref[pl.ds(kh, TH, stride=S), pl.ds(kw, Wo, stride=S), :]
        return win.reshape(M, C1)

    if concat_path:
        # C1 % 128 == 0: lane-aligned concat -> a single big MXU matmul.
        patches = jnp.concatenate(
            [window(kh, kw) for kh in range(K) for kw in range(K)], axis=-1)
        acc = jnp.dot(patches, w_ref[...], preferred_element_type=jnp.float32)
    else:
        # Unaligned C1: K*K accumulated matmuls against contiguous sublane
        # slices of the weights (no lane-rotate/select chains, no patches buffer).
        acc = None
        idx = 0
        for kh in range(K):
            for kw in range(K):
                part = jnp.dot(window(kh, kw), w_ref[pl.ds(idx * C1, C1), :],
                               preferred_element_type=jnp.float32)
                acc = part if acc is None else acc + part
                idx += 1

    z = acc + shift_ref[...]                                   # BN (scale folded into w)
    # SiLU with EUP-friendly sigmoid: exp + approximate reciprocal (frees VALU slots).
    y = z * pl.reciprocal(1.0 + jnp.exp(-z), approx=True)
    o_ref[...] = y.astype(o_ref.dtype)


def conv_bn_silu(x_nchw, weight, gamma, beta, running_mean, running_var,
                 *, stride=1, padding=None, eps=1e-5, compute_dtype=None):
    """Forward of yolov5-face `Conv`. x_nchw: (N, C1, H, W), weight: (C2, C1, K, K).

    `compute_dtype=jnp.bfloat16` runs the matmul in bf16 (f32 accumulation) for
    production; left at the input dtype here so the f32 test stays tight.
    """
    N, C1, H, W = x_nchw.shape
    C2, C1w, K, _ = weight.shape
    assert C1w == C1, "groups != 1 not supported in this synthetic kernel"
    P = autopad(K, padding)
    S = stride

    Ho = (H + 2 * P - K) // S + 1
    Wo = (W + 2 * P - K) // S + 1
    Hp, Wp = H + 2 * P, W + 2 * P

    LANE = 128
    C2p = ((C2 + LANE - 1) // LANE) * LANE                     # lane-dense output width

    cdt = jnp.dtype(compute_dtype) if compute_dtype is not None else x_nchw.dtype

    # --- host-side glue: layout, zero-pad, BN folding ---
    # TODO(synk): keeping activations NHWC end-to-end across the network (and doing
    # the zero-pad in-kernel via halo masking) would remove these extra HBM
    # round-trips; kept here only to preserve the PyTorch NCHW module interface.
    x = jnp.transpose(x_nchw, (0, 2, 3, 1)).astype(cdt)        # NCHW -> NHWC
    x = jnp.pad(x, ((0, 0), (P, P), (P, P), (0, 0)))           # zero pad spatially

    scale = (gamma / jnp.sqrt(running_var + eps)).astype(jnp.float32)      # (C2,)
    shift = beta.astype(jnp.float32) - running_mean.astype(jnp.float32) * scale

    w_hwio = jnp.transpose(weight, (2, 3, 1, 0)).astype(jnp.float32)       # (K,K,C1,C2)
    w_folded = w_hwio * scale[None, None, None, :]             # fold BN scale into conv
    w_packed = jnp.pad(w_folded, ((0, 0), (0, 0), (0, 0), (0, C2p - C2)))
    w_packed = w_packed.reshape(K * K * C1, C2p).astype(cdt)
    shift_p = jnp.pad(shift, (0, C2p - C2)).reshape(1, C2p)    # stays f32

    # Generation-aware VMEM budget: query capacity, leave headroom for compiler scratch.
    cap = _vmem_capacity_bytes()
    vmem_limit = max(32 << 20, min(int(cap * 0.85), cap - (8 << 20), 112 << 20))
    itemsize = jnp.dtype(cdt).itemsize
    TH = _pick_row_tile(Ho, Wo, Wp, C1, C2p, K, S, itemsize, int(vmem_limit * 0.7))
    R = Ho // TH
    TH_in = (TH - 1) * S + K                                   # halo'd input rows per tile

    # Unfold into streamed halo'd row windows (only K-S duplicated rows per window);
    # the pipeline then fetches exactly one window per grid step.
    row_idx = (jnp.arange(R) * (TH * S))[:, None] + jnp.arange(TH_in)[None, :]
    x_win = x[:, row_idx]                                      # (N, R, TH_in, Wp, C1)

    concat_path = (C1 % LANE == 0)
    kernel = functools.partial(_conv_bn_silu_kernel, K=K, S=S, TH=TH, Wo=Wo,
                               C1=C1, concat_path=concat_path)

    out = pl.pallas_call(
        kernel,
        out_shape=jax.ShapeDtypeStruct((N, Ho * Wo, C2p), x_nchw.dtype),
        grid_spec=pltpu.PrefetchScalarGridSpec(
            num_scalar_prefetch=0,
            grid=(N, R),
            in_specs=[
                # One halo'd row window per step (auto double-buffered stream).
                pl.BlockSpec((None, None, TH_in, Wp, C1),
                             lambda n, r: (n, r, 0, 0, 0)),
                # Constant-index weights / shift: single-buffered residents.
                pl.BlockSpec((K * K * C1, C2p), lambda n, r: (0, 0),
                             pipeline_mode=pl.Buffered(1)),
                pl.BlockSpec((1, C2p), lambda n, r: (0, 0),
                             pipeline_mode=pl.Buffered(1)),
            ],
            out_specs=pl.BlockSpec((None, TH * Wo, C2p), lambda n, r: (n, r, 0)),
        ),
        compiler_params=pltpu.CompilerParams(
            dimension_semantics=("parallel", "parallel"),
            vmem_limit_bytes=vmem_limit,
        ),
    )(x_win, w_packed, shift_p)

    out = out.reshape(N, Ho, Wo, C2p)[..., :C2]                # drop channel padding
    return jnp.transpose(out, (0, 3, 1, 2))                    # NHWC -> NCHW


def _reference(x_nchw, weight, gamma, beta, mean, var, *, stride, padding, eps=1e-5):
    P = autopad(weight.shape[-1], padding)
    y = jax.lax.conv_general_dilated(
        x_nchw.astype(jnp.float32), weight.astype(jnp.float32),
        window_strides=(stride, stride), padding=[(P, P), (P, P)],
        dimension_numbers=("NCHW", "OIHW", "NCHW"),
    )
    scale = (gamma / jnp.sqrt(var + eps)).reshape(1, -1, 1, 1)
    shift = (beta - mean * scale[0, :, 0, 0]).reshape(1, -1, 1, 1)
    z = y * scale + shift
    return z * jax.nn.sigmoid(z)


if __name__ == "__main__":
    key = jax.random.PRNGKey(0)
    k_x, k_w, k_g, k_b, k_m, k_v = jax.random.split(key, 6)

    # Conv(c1=4, c2=8, k=3, s=1) on a (2, 4, 16, 16) NCHW input.
    N, C1, H, W = 2, 4, 16, 16
    C2, K, S = 8, 3, 1

    x = jax.random.normal(k_x, (N, C1, H, W), dtype=jnp.float32)
    weight = jax.random.normal(k_w, (C2, C1, K, K), dtype=jnp.float32) * 0.1
    gamma = jax.random.uniform(k_g, (C2,), minval=0.5, maxval=1.5, dtype=jnp.float32)
    beta = jax.random.normal(k_b, (C2,), dtype=jnp.float32) * 0.1
    running_mean = jax.random.normal(k_m, (C2,), dtype=jnp.float32) * 0.1
    running_var = jax.random.uniform(k_v, (C2,), minval=0.5, maxval=1.5, dtype=jnp.float32)

    out = conv_bn_silu(x, weight, gamma, beta, running_mean, running_var,
                       stride=S, padding=None)
    out = jax.block_until_ready(out)

    ref = _reference(x, weight, gamma, beta, running_mean, running_var,
                     stride=S, padding=None)
    # Tolerance relaxed slightly because the SiLU epilogue uses the EUP
    # approximate reciprocal (pl.reciprocal(..., approx=True)).
    np.testing.assert_allclose(np.asarray(out), np.asarray(ref), rtol=5e-3, atol=5e-3)

    print("KERNEL_OK")
</pallas_src>

<mosaic_0001>
module attributes {stable_mosaic.version = 11 : i64} {
  func.func @_conv_bn_silu_kernel(%arg0: i32, %arg1: i32, %arg2: memref<1x1x18x18x4xf32, #tpu.memory_space<vmem>>, %arg3: memref<36x128xf32, #tpu.memory_space<vmem>>, %arg4: memref<1x128xf32, #tpu.memory_space<vmem>>, %arg5: memref<1x256x128xf32, #tpu.memory_space<vmem>>) attributes {dimension_semantics = [#tpu.dimension_semantics<parallel>, #tpu.dimension_semantics<parallel>], iteration_bounds = array<i64: 2, 1>, scalar_prefetch = 0 : i64, scratch_operands = 0 : i64, tpu.core_type = #tpu.core_type<tc>, window_params = [{transform_indices = @transform_0, window_bounds = array<i64: 1, 1, 18, 18, 4>}, {pipeline_mode = #tpu.pipeline_mode<synchronous>, transform_indices = @transform_1, window_bounds = array<i64: 36, 128>}, {pipeline_mode = #tpu.pipeline_mode<synchronous>, transform_indices = @transform_2, window_bounds = array<i64: 1, 128>}, {transform_indices = @transform_3, window_bounds = array<i64: 1, 256, 128>}]} {
    %c0 = arith.constant 0 : index
    %c0_0 = arith.constant 0 : index
    %c0_1 = arith.constant 0 : index
    %c0_2 = arith.constant 0 : index
    %c0_3 = arith.constant 0 : index
    %0 = vector.load %arg2[%c0, %c0_0, %c0_1, %c0_2, %c0_3] : memref<1x1x18x18x4xf32, #tpu.memory_space<vmem>>, vector<1x1x16x16x4xf32>
    %1 = vector.shape_cast %0 : vector<1x1x16x16x4xf32> to vector<16x16x4xf32>
    %2 = vector.shape_cast %1 : vector<16x16x4xf32> to vector<256x4xf32>
    %c0_4 = arith.constant 0 : index
    %c0_5 = arith.constant 0 : index
    %3 = vector.load %arg3[%c0_4, %c0_5] : memref<36x128xf32, #tpu.memory_space<vmem>>, vector<4x128xf32>
    %cst = arith.constant dense<0.000000e+00> : vector<256x128xf32>
    %4 = tpu.matmul %2, %3, %cst {dimension_numbers = #tpu.dot_dimension_numbers<[1], [0], [0], [1], [0, 0, 1, 1], [], []>} : vector<256x4xf32>, vector<4x128xf32>, vector<256x128xf32> -> vector<256x128xf32>
    %c0_6 = arith.constant 0 : index
    %c0_7 = arith.constant 0 : index
    %c0_8 = arith.constant 0 : index
    %c1 = arith.constant 1 : index
    %c0_9 = arith.constant 0 : index
    %5 = vector.load %arg2[%c0_6, %c0_7, %c0_8, %c1, %c0_9] : memref<1x1x18x18x4xf32, #tpu.memory_space<vmem>>, vector<1x1x16x16x4xf32>
    %6 = vector.shape_cast %5 : vector<1x1x16x16x4xf32> to vector<16x16x4xf32>
    %7 = vector.shape_cast %6 : vector<16x16x4xf32> to vector<256x4xf32>
    %c4 = arith.constant 4 : index
    %c0_10 = arith.constant 0 : index
    %8 = vector.load %arg3[%c4, %c0_10] : memref<36x128xf32, #tpu.memory_space<vmem>>, vector<4x128xf32>
    %cst_11 = arith.constant dense<0.000000e+00> : vector<256x128xf32>
    %9 = tpu.matmul %7, %8, %cst_11 {dimension_numbers = #tpu.dot_dimension_numbers<[1], [0], [0], [1], [0, 0, 1, 1], [], []>} : vector<256x4xf32>, vector<4x128xf32>, vector<256x128xf32> -> vector<256x128xf32>
    %10 = arith.addf %4, %9 : vector<256x128xf32>
    %c0_12 = arith.constant 0 : index
    %c0_13 = arith.constant 0 : index
    %c0_14 = arith.constant 0 : index
    %c2 = arith.constant 2 : index
    %c0_15 = arith.constant 0 : index
    %11 = vector.load %arg2[%c0_12, %c0_13, %c0_14, %c2, %c0_15] : memref<1x1x18x18x4xf32, #tpu.memory_space<vmem>>, vector<1x1x16x16x4xf32>
    %12 = vector.shape_cast %11 : vector<1x1x16x16x4xf32> to vector<16x16x4xf32>
    %13 = vector.shape_cast %12 : vector<16x16x4xf32> to vector<256x4xf32>
    %c8 = arith.constant 8 : index
    %c0_16 = arith.constant 0 : index
    %14 = vector.load %arg3[%c8, %c0_16] : memref<36x128xf32, #tpu.memory_space<vmem>>, vector<4x128xf32>
    %cst_17 = arith.constant dense<0.000000e+00> : vector<256x128xf32>
    %15 = tpu.matmul %13, %14, %cst_17 {dimension_numbers = #tpu.dot_dimension_numbers<[1], [0], [0], [1], [0, 0, 1, 1], [], []>} : vector<256x4xf32>, vector<4x128xf32>, vector<256x128xf32> -> vector<256x128xf32>
    %16 = arith.addf %10, %15 : vector<256x128xf32>
    %c0_18 = arith.constant 0 : index
    %c0_19 = arith.constant 0 : index
    %c1_20 = arith.constant 1 : index
    %c0_21 = arith.constant 0 : index
    %c0_22 = arith.constant 0 : index
    %17 = vector.load %arg2[%c0_18, %c0_19, %c1_20, %c0_21, %c0_22] : memref<1x1x18x18x4xf32, #tpu.memory_space<vmem>>, vector<1x1x16x16x4xf32>
    %18 = vector.shape_cast %17 : vector<1x1x16x16x4xf32> to vector<16x16x4xf32>
    %19 = vector.shape_cast %18 : vector<16x16x4xf32> to vector<256x4xf32>
    %c12 = arith.constant 12 : index
    %c0_23 = arith.constant 0 : index
    %20 = vector.load %arg3[%c12, %c0_23] : memref<36x128xf32, #tpu.memory_space<vmem>>, vector<4x128xf32>
    %cst_24 = arith.constant dense<0.000000e+00> : vector<256x128xf32>
    %21 = tpu.matmul %19, %20, %cst_24 {dimension_numbers = #tpu.dot_dimension_numbers<[1], [0], [0], [1], [0, 0, 1, 1], [], []>} : vector<256x4xf32>, vector<4x128xf32>, vector<256x128xf32> -> vector<256x128xf32>
    %22 = arith.addf %16, %21 : vector<256x128xf32>
    %c0_25 = arith.constant 0 : index
    %c0_26 = arith.constant 0 : index
    %c1_27 = arith.constant 1 : index
    %c1_28 = arith.constant 1 : index
    %c0_29 = arith.constant 0 : index
    %23 = vector.load %arg2[%c0_25, %c0_26, %c1_27, %c1_28, %c0_29] : memref<1x1x18x18x4xf32, #tpu.memory_space<vmem>>, vector<1x1x16x16x4xf32>
    %24 = vector.shape_cast %23 : vector<1x1x16x16x4xf32> to vector<16x16x4xf32>
    %25 = vector.shape_cast %24 : vector<16x16x4xf32> to vector<256x4xf32>
    %c16 = arith.constant 16 : index
    %c0_30 = arith.constant 0 : index
    %26 = vector.load %arg3[%c16, %c0_30] : memref<36x128xf32, #tpu.memory_space<vmem>>, vector<4x128xf32>
    %cst_31 = arith.constant dense<0.000000e+00> : vector<256x128xf32>
    %27 = tpu.matmul %25, %26, %cst_31 {dimension_numbers = #tpu.dot_dimension_numbers<[1], [0], [0], [1], [0, 0, 1, 1], [], []>} : vector<256x4xf32>, vector<4x128xf32>, vector<256x128xf32> -> vector<256x128xf32>
    %28 = arith.addf %22, %27 : vector<256x128xf32>
    %c0_32 = arith.constant 0 : index
    %c0_33 = arith.constant 0 : index
    %c1_34 = arith.constant 1 : index
    %c2_35 = arith.constant 2 : index
    %c0_36 = arith.constant 0 : index
    %29 = vector.load %arg2[%c0_32, %c0_33, %c1_34, %c2_35, %c0_36] : memref<1x1x18x18x4xf32, #tpu.memory_space<vmem>>, vector<1x1x16x16x4xf32>
    %30 = vector.shape_cast %29 : vector<1x1x16x16x4xf32> to vector<16x16x4xf32>
    %31 = vector.shape_cast %30 : vector<16x16x4xf32> to vector<256x4xf32>
    %c20 = arith.constant 20 : index
    %c0_37 = arith.constant 0 : index
    %32 = vector.load %arg3[%c20, %c0_37] : memref<36x128xf32, #tpu.memory_space<vmem>>, vector<4x128xf32>
    %cst_38 = arith.constant dense<0.000000e+00> : vector<256x128xf32>
    %33 = tpu.matmul %31, %32, %cst_38 {dimension_numbers = #tpu.dot_dimension_numbers<[1], [0], [0], [1], [0, 0, 1, 1], [], []>} : vector<256x4xf32>, vector<4x128xf32>, vector<256x128xf32> -> vector<256x128xf32>
    %34 = arith.addf %28, %33 : vector<256x128xf32>
    %c0_39 = arith.constant 0 : index
    %c0_40 = arith.constant 0 : index
    %c2_41 = arith.constant 2 : index
    %c0_42 = arith.constant 0 : index
    %c0_43 = arith.constant 0 : index
    %35 = vector.load %arg2[%c0_39, %c0_40, %c2_41, %c0_42, %c0_43] : memref<1x1x18x18x4xf32, #tpu.memory_space<vmem>>, vector<1x1x16x16x4xf32>
    %36 = vector.shape_cast %35 : vector<1x1x16x16x4xf32> to vector<16x16x4xf32>
    %37 = vector.shape_cast %36 : vector<16x16x4xf32> to vector<256x4xf32>
    %c24 = arith.constant 24 : index
    %c0_44 = arith.constant 0 : index
    %38 = vector.load %arg3[%c24, %c0_44] : memref<36x128xf32, #tpu.memory_space<vmem>>, vector<4x128xf32>
    %cst_45 = arith.constant dense<0.000000e+00> : vector<256x128xf32>
    %39 = tpu.matmul %37, %38, %cst_45 {dimension_numbers = #tpu.dot_dimension_numbers<[1], [0], [0], [1], [0, 0, 1, 1], [], []>} : vector<256x4xf32>, vector<4x128xf32>, vector<256x128xf32> -> vector<256x128xf32>
    %40 = arith.addf %34, %39 : vector<256x128xf32>
    %c0_46 = arith.constant 0 : index
    %c0_47 = arith.constant 0 : index
    %c2_48 = arith.constant 2 : index
    %c1_49 = arith.constant 1 : index
    %c0_50 = arith.constant 0 : index
    %41 = vector.load %arg2[%c0_46, %c0_47, %c2_48, %c1_49, %c0_50] : memref<1x1x18x18x4xf32, #tpu.memory_space<vmem>>, vector<1x1x16x16x4xf32>
    %42 = vector.shape_cast %41 : vector<1x1x16x16x4xf32> to vector<16x16x4xf32>
    %43 = vector.shape_cast %42 : vector<16x16x4xf32> to vector<256x4xf32>
    %c28 = arith.constant 28 : index
    %c0_51 = arith.constant 0 : index
    %44 = vector.load %arg3[%c28, %c0_51] : memref<36x128xf32, #tpu.memory_space<vmem>>, vector<4x128xf32>
    %cst_52 = arith.constant dense<0.000000e+00> : vector<256x128xf32>
    %45 = tpu.matmul %43, %44, %cst_52 {dimension_numbers = #tpu.dot_dimension_numbers<[1], [0], [0], [1], [0, 0, 1, 1], [], []>} : vector<256x4xf32>, vector<4x128xf32>, vector<256x128xf32> -> vector<256x128xf32>
    %46 = arith.addf %40, %45 : vector<256x128xf32>
    %c0_53 = arith.constant 0 : index
    %c0_54 = arith.constant 0 : index
    %c2_55 = arith.constant 2 : index
    %c2_56 = arith.constant 2 : index
    %c0_57 = arith.constant 0 : index
    %47 = vector.load %arg2[%c0_53, %c0_54, %c2_55, %c2_56, %c0_57] : memref<1x1x18x18x4xf32, #tpu.memory_space<vmem>>, vector<1x1x16x16x4xf32>
    %48 = vector.shape_cast %47 : vector<1x1x16x16x4xf32> to vector<16x16x4xf32>
    %49 = vector.shape_cast %48 : vector<16x16x4xf32> to vector<256x4xf32>
    %c32 = arith.constant 32 : index
    %c0_58 = arith.constant 0 : index
    %50 = vector.load %arg3[%c32, %c0_58] : memref<36x128xf32, #tpu.memory_space<vmem>>, vector<4x128xf32>
    %cst_59 = arith.constant dense<0.000000e+00> : vector<256x128xf32>
    %51 = tpu.matmul %49, %50, %cst_59 {dimension_numbers = #tpu.dot_dimension_numbers<[1], [0], [0], [1], [0, 0, 1, 1], [], []>} : vector<256x4xf32>, vector<4x128xf32>, vector<256x128xf32> -> vector<256x128xf32>
    %52 = arith.addf %46, %51 : vector<256x128xf32>
    %c0_60 = arith.constant 0 : index
    %c0_61 = arith.constant 0 : index
    %53 = vector.load %arg4[%c0_60, %c0_61] : memref<1x128xf32, #tpu.memory_space<vmem>>, vector<1x128xf32>
    %54 = vector.broadcast %53 : vector<1x128xf32> to vector<256x128xf32>
    %55 = arith.addf %52, %54 : vector<256x128xf32>
    %cst_62 = arith.constant 0.000000e+00 : f32
    %56 = vector.broadcast %cst_62 : f32 to vector<256x128xf32>
    %57 = arith.subf %56, %55 : vector<256x128xf32>
    %58 = math.exp %57 : vector<256x128xf32>
    %cst_63 = arith.constant 1.000000e+00 : f32
    %59 = vector.broadcast %cst_63 : f32 to vector<256x128xf32>
    %60 = arith.addf %59, %58 : vector<256x128xf32>
    %61 = tpu.reciprocal %60 {approx = true} : vector<256x128xf32> -> vector<256x128xf32>
    %62 = arith.mulf %55, %61 : vector<256x128xf32>
    %c0_64 = arith.constant 0 : index
    %c0_65 = arith.constant 0 : index
    %c0_66 = arith.constant 0 : index
    %63 = vector.load %arg5[%c0_64, %c0_65, %c0_66] : memref<1x256x128xf32, #tpu.memory_space<vmem>>, vector<1x256x128xf32>
    %64 = vector.shape_cast %63 : vector<1x256x128xf32> to vector<256x128xf32>
    %65 = vector.shape_cast %62 : vector<256x128xf32> to vector<1x256x128xf32>
    tpu.vector_store %arg5[%c0_64, %c0_65, %c0_66], %65 {strides = array<i32>} : memref<1x256x128xf32, #tpu.memory_space<vmem>>, vector<1x256x128xf32>,
    return
  }
  func.func @transform_0(%arg0: i32, %arg1: i32) -> (i32, i32, i32, i32, i32) {
    %c0_i32 = arith.constant 0 : i32
    %c0_i32_0 = arith.constant 0 : i32
    %c0_i32_1 = arith.constant 0 : i32
    %c0_i32_2 = arith.constant 0 : i32
    return %arg0, %arg1, %c0_i32, %c0_i32_0, %c0_i32_1 : i32, i32, i32, i32, i32
  }
  func.func @transform_1(%arg0: i32, %arg1: i32) -> (i32, i32) {
    %c0_i32 = arith.constant 0 : i32
    %c0_i32_0 = arith.constant 0 : i32
    %c0_i32_1 = arith.constant 0 : i32
    return %c0_i32, %c0_i32_0 : i32, i32
  }
  func.func @transform_2(%arg0: i32, %arg1: i32) -> (i32, i32) {
    %c0_i32 = arith.constant 0 : i32
    %c0_i32_0 = arith.constant 0 : i32
    %c0_i32_1 = arith.constant 0 : i32
    return %c0_i32, %c0_i32_0 : i32, i32
  }
  func.func @transform_3(%arg0: i32, %arg1: i32) -> (i32, i32, i32) {
    %c0_i32 = arith.constant 0 : i32
    %c0_i32_0 = arith.constant 0 : i32
    return %arg0, %arg1, %c0_i32 : i32, i32, i32
  }
}

</mosaic_0001>

<bundles_post_ra>
// kernel: tpu_custom_call.1
= control target key start
LH: loop header
LB: loop body
LE: loop exit
PB: predicated region body
PF: predicated region fallthrough
CT: control target
= control target key end

     0   :  { %8 = vsyncpa [#allocation3], 0  ;;  %s7064_s0 = inlined_call_operand.vmem [shape: f32[2,1,18,18,4], index: 0, kind: input, shape index: {}]   ;;  %s7065_s1 = inlined_call_operand.vmem [shape: f32[36,128], index: 1, kind: input, shape index: {}]   ;;  %s7066_s2 = inlined_call_operand.vmem [shape: f32[1,128], index: 2, kind: input, shape index: {}]   ;;  %s7067_s3 = inlined_call_operand.hbm [shape: f32[2,256,128], index: 3, kind: output, shape index: {}]  }
   0x1   :  { %10 = vsyncpa [#allocation3 + $0x1], 0  ;;  %s5797_s12 = smov 0   ;;  %s5799_s13 = smov 0  }
   0x2   :  { %s5801_s14 = smov 0   ;;  %s5803_s15 = smov 0  }
   0x3   :  { %s5805_s16 = smov 0   ;;  %s5807_s17 = smov 0  }
   0x4 LB: > { %s4000_s18 = sadd.s32 4294967295, %s5772_s17   ;;  %s4001_s19 = sadd.s32 4294967294, %s5772_s17   ;;  %s5772_s17 = sphi %s5807_s17, %s16_s17   ;;  %s5768_s16 = sphi %s5805_s16, %s7183_s16   ;;  %s5764_s15 = sphi %s5803_s15, %s7182_s15   ;;  %s5760_s14 = sphi %s5801_s14, %s7181_s14   ;;  %s5756_s13 = sphi %s5799_s13, %s7180_s13   ;;  %s5752_s12 = sphi %s5797_s12, %s7179_s12  }
   0x5   : > { %s28_s20 = sadd.s32 1, %s5768_s16  ;;  %s107_s21 = sadd.s32 1, %s5760_s14 }
   0x6   : > { %p30_p0 = scmp.ge.s32.totalorder %s28_s20, 2  ;;  %p117_p1 = scmp.ne.s32.totalorder %s5760_s14, %s5756_s13 }
   0x7   : > { %p118_p2 = scmp.eq.s32.totalorder %s4000_s18, 1  ;;  %p123_p3 = scmp.ne.s32.totalorder %s5756_s13, %s5752_s12 }
   0x8   : > { %s7185_s20 = smov (%p30_p0, %s28_s20), 0  ;;  %p124_p5 = scmp.eq.s32.totalorder %s4001_s19, 1 }
   0x9   : > { %p5837_p4 = por %p118_p2, %p117_p1  ;;  %s102_s23 = ssub.s32 %s5768_s16, %s7185_s20 }
   0xa   : > { %p4004_p6 = scmp.ge.s32.totalorder %s5772_s17, 1  ;;  %p105_p7 = scmp.eq.s32.totalorder %s102_s23, 0 }
   0xb   : > { %p5844_p8 = por %p124_p5, %p123_p3  ;;  %p160_p9 = scmp.lt.s32.totalorder %s5772_s17, 3 }
   0xc   : > { %s5850_s25 = scalar_select %p105_p7, %s5760_s14, %s107_s21  }
   0xd   : > { %p161_p10 = pnand %p4004_p6, %p160_p9 }
   0xf   : > { %164 = sbr.rel (%p161_p10) target bundleno = 582 (0x246), region = 32 }
  0x16   : > { %v263_v0 = vld [vmem:[%s7065_s1 + $0x4] sm:$0xf]  ;;  %vm361_vm0 = vcmask 1043456   ;;  %v5858_v1 = vld [vmem:[%s7065_s1 + $0x10] sm:$0xf]  ;;  %p188_p11 = scmp.lt.s32.totalorder %s5764_s15, 1 }
  0x17   : > { %4800 = vmatprep.subr.msk.mxu1 %vm361_vm0, %v263_v0  ;;  %5000 = vmatprep.subr.msk.mxu0 %vm361_vm0, %v5858_v1  ;;  %v230_v2 = vld [vmem:[%s7065_s1] sm:$0xf]  ;;  %v2114_v3 = vld [vmem:[%s7065_s1 + $0x14] sm:$0xf]  ;;  %vm264_vm1 = vcmask 31744   ;;  %s4502_s10 = sshll.u32 %s5764_s15, 12 }
  0x18   : > { %4801 = vmatpush3.msk.msra.mxu1 %vm361_vm0, %v263_v0  ;;  %5001 = vmatpush3.msk.msra.mxu0 %vm361_vm0, %v5858_v1  ;;  %s189_s7 = scalar_select %p188_p11, %s5764_s15, 1  ;;  %v2504_v9 = vld [vmem:[%s7065_s1 + $0x18] sm:$0xf]  ;;  %v5898_v10 = vld [vmem:[%s7065_s1 + $0x8] sm:$0xf] }
  0x19   : > { %4850 = vmatprep.subr.msk.mxu1 %vm361_vm0, %v230_v2  ;;  %5050 = vmatprep.subr.msk.mxu0 %vm361_vm0, %v2114_v3  ;;  %v6017_v28 = vld [vmem:[%s7065_s1 + $0x1c] sm:$0xf]  ;;  %v6180_v61 = vld [vmem:[%s7065_s1 + $0xc] sm:$0xf]  ;;  %s7010_s21 = scalar_lea.hbm %s7067_s3, %s4502_s10  ;;  %s5774_s26 = smov [#allocation2]  }
  0x1a   : > { %s5508_s8 = smul.u32 432, %s189_s7  ;;  %s185_s7 = sand.u32 1, %s5756_s13  }
  0x1b   : > { %s7018_s15 = scalar_lea.sflag [#allocation3], %s185_s7  ;;  %s5698_s27 = sshll.u32 %s5774_s26, 4  ;;  %s5699_s27 = int_to_ptr.vmem [resolvable:$false] %s5698_s27 }
  0x1c   : > { %s5879_s11 = scalar_lea.vmem %s7064_s0, %s5508_s8  ;;  %s6862_s8 = sshll.u32 %s185_s7, 8 }
  0x1d   : > { %v231_v4 = vld [vmem:[%s5879_s11 + $0x1] sm:$0xff]  ;;  %v4171_v5 = vld [vmem:[%s5879_s11 + $0x19] sm:$0xff]  ;;  %v232_v6 = vld [vmem:[%s5879_s11 + $0x9] sm:$0xff]  ;;  %s6879_s9 = scalar_lea.vmem [#allocation2], %s6862_s8  ;;  %s5700_s28 = scalar_lea.vmem %s5699_s27, 8192 }
  0x1e   : > { %4802 = vmatprep.mubr.msk.f32.mxu1 %vm264_vm1, %v231_v4  ;;  %5002 = vmatprep.mubr.msk.f32.mxu0 %vm264_vm1, %v4171_v5  ;;  %v4172_v7 = vld [vmem:[%s5879_s11 + $0x21] sm:$0xff]  ;;  %v5888_v8 = vld [vmem:[%s5879_s11 + $0x31] sm:$0xff]  ;;  %v5903_v11 = vld [vmem:[%s5879_s11 + $0x39] sm:$0xff] }
  0x1f   : > { %4803 = vmatmul.mubr.msk.f32.vlgmr.msra.gmra.mrb[0].mxu1 %vm264_vm1, %v232_v6  ;;  %5003 = vmatmul.mubr.msk.f32.vlgmr.msra.gmra.mrb[0].mxu0 %vm264_vm1, %v4172_v7  ;;  %v5909_v12 = vld [vmem:[%s5879_s11 + $0x49] sm:$0xff]  ;;  %v5922_v13 = vld [vmem:[%s5879_s11 + $0x51] sm:$0xff]  ;;  %v5925_v14 = vld [vmem:[%s5879_s11 + $0x61] sm:$0xff] }
  0x20   : > { %4851 = vmatpush3.msk.msra.mxu1 %vm361_vm0, %v230_v2  ;;  %5051 = vmatpush3.msk.msra.mxu0 %vm361_vm0, %v2114_v3  ;;  %v5936_v15 = vld [vmem:[%s5879_s11 + $0x69] sm:$0xff]  ;;  %v5939_v16 = vld [vmem:[%s5879_s11 + $0x79] sm:$0xff]  ;;  %v5950_v17 = vld [vmem:[%s5879_s11 + $0x81] sm:$0xff] }
  0x21   : > { %4805 = vmatprep.mubr.msk.f32.mxu1 %vm264_vm1, %v4171_v5  ;;  %5005 = vmatprep.mubr.msk.f32.mxu0 %vm264_vm1, %v5888_v8  ;;  %v5953_v18 = vld [vmem:[%s5879_s11 + $0x91] sm:$0xff]  ;;  %v5964_v19 = vld [vmem:[%s5879_s11 + $0x99] sm:$0xff]  ;;  %v5967_v20 = vld [vmem:[%s5879_s11 + $0xa9] sm:$0xff] }
  0x22   : > { %5100 = vmatprep.subr.msk.mxu0 %vm361_vm0, %v2504_v9  ;;  %4900 = vmatprep.subr.msk.mxu1 %vm361_vm0, %v5898_v10  ;;  %v5978_v21 = vld [vmem:[%s5879_s11 + $0xb1] sm:$0xff]  ;;  %v5981_v22 = vld [vmem:[%s5879_s11 + $0xc1] sm:$0xff]  ;;  %v5992_v23 = vld [vmem:[%s5879_s11 + $0xc9] sm:$0xff] }
  0x23   : > { %4806 = vmatmul.mubr.msk.f32.gmra.mrb[2].mxu1 %vm264_vm1, %v4172_v7  ;;  %5006 = vmatmul.mubr.msk.f32.gmra.mrb[2].mxu0 %vm264_vm1, %v5903_v11  ;;  %v5995_v24 = vld [vmem:[%s5879_s11 + $0x1a] sm:$0xff]  ;;  %v6006_v25 = vld [vmem:[%s5879_s11 + $0x22] sm:$0xff]  ;;  %v6012_v27 = vld [vmem:[%s5879_s11 + $0x32] sm:$0xff] }
  0x24   : > { %4808 = vmatprep.mubr.msk.f32.mxu1 %vm264_vm1, %v5888_v8  ;;  %5008 = vmatprep.mubr.msk.f32.mxu0 %vm264_vm1, %v5909_v12  ;;  %v6009_v26 = vld [vmem:[%s5879_s11 + $0xd9] sm:$0xff]  ;;  %v6027_v29 = vld [vmem:[%s5879_s11 + $0xe1] sm:$0xff]  ;;  %v6035_v31 = vld [vmem:[%s5879_s11 + $0xf1] sm:$0xff] }
  0x25   : > { %7115 = vst [vmem:[#allocation5_spill] sm:$0xff] %v6027_v29  ;;  %v6030_v30 = vld [vmem:[%s5879_s11 + $0x3a] sm:$0xff]  ;;  %7116 = vst [vmem:[#allocation6_spill] sm:$0xff] %v6035_v31  ;;  %v6038_v32 = vld [vmem:[%s5879_s11 + $0x4a] sm:$0xff] }
  0x26   : > { %v6051_v33 = vld [vmem:[%s5879_s11 + $0xf9] sm:$0xff]  ;;  %v6057_v35 = vld [vmem:[%s5879_s11 + $0x109] sm:$0xff]  ;;  %v6071_v37 = vld [vmem:[%s5879_s11 + $0x111] sm:$0xff] }
  0x27   : > { %4809 = vmatmul.mubr.msk.f32.gmra.mrb[4].mxu1 %vm264_vm1, %v5903_v11  ;;  %5009 = vmatmul.mubr.msk.f32.gmra.mrb[4].mxu0 %vm264_vm1, %v5922_v13  ;;  %7117 = vst [vmem:[#allocation7_spill] sm:$0xff] %v6051_v33  ;;  %v6054_v34 = vld [vmem:[%s5879_s11 + $0x52] sm:$0xff]  ;;  %7118 = vst [vmem:[#allocation8_spill] sm:$0xff] %v6057_v35  ;;  %v6060_v36 = vld [vmem:[%s5879_s11 + $0x62] sm:$0xff] }
  0x28   : > { %4811 = vmatprep.mubr.msk.f32.mxu1 %vm264_vm1, %v5909_v12  ;;  %5011 = vmatprep.mubr.msk.f32.mxu0 %vm264_vm1, %v5925_v14  ;;  %7119 = vst [vmem:[#allocation9_spill] sm:$0xff] %v6071_v37  ;;  %v6074_v38 = vld [vmem:[%s5879_s11 + $0x6a] sm:$0xff]  ;;  %v6077_v39 = vld [vmem:[%s5879_s11 + $0x121] sm:$0xff]  ;;  %v6097_v43 = vld [vmem:[%s5879_s11 + $0x139] sm:$0xff] }
  0x29   : > { %7120 = vst [vmem:[#allocation10_spill] sm:$0xff] %v6077_v39  ;;  %v6080_v40 = vld [vmem:[%s5879_s11 + $0x7a] sm:$0xff]  ;;  %v6091_v41 = vld [vmem:[%s5879_s11 + $0x129] sm:$0xff]  ;;  %7122 = vst [vmem:[#allocation12_spill] sm:$0xff] %v6097_v43 }
  0x2a   : > { %7121 = vst [vmem:[#allocation11_spill] sm:$0xff] %v6091_v41  ;;  %v6094_v42 = vld [vmem:[%s5879_s11 + $0x82] sm:$0xff]  ;;  %v6100_v44 = vld [vmem:[%s5879_s11 + $0x92] sm:$0xff]  ;;  %v6114_v46 = vld [vmem:[%s5879_s11 + $0x9a] sm:$0xff] }
  0x2b   : > { %4812 = vmatmul.mubr.msk.f32.gmra.mrb[6].mxu1 %vm264_vm1, %v5922_v13  ;;  %5012 = vmatmul.mubr.msk.f32.gmra.mrb[6].mxu0 %vm264_vm1, %v5936_v15  ;;  %v6111_v45 = vld [vmem:[%s5879_s11 + $0x141] sm:$0xff]  ;;  %v6117_v47 = vld [vmem:[%s5879_s11 + $0x151] sm:$0xff]  ;;  %v6131_v49 = vld [vmem:[%s5879_s11 + $0x159] sm:$0xff] }
  0x2c   : > { %4814 = vmatprep.mubr.msk.f32.mxu1 %vm264_vm1, %v5925_v14  ;;  %5014 = vmatprep.mubr.msk.f32.mxu0 %vm264_vm1, %v5939_v16  ;;  %7123 = vst [vmem:[#allocation13_spill] sm:$0xff] %v6111_v45  ;;  %7124 = vst [vmem:[#allocation14_spill] sm:$0xff] %v6117_v47  ;;  %v6120_v48 = vld [vmem:[%s5879_s11 + $0xaa] sm:$0xff]  ;;  %v6134_v50 = vld [vmem:[%s5879_s11 + $0xb2] sm:$0xff] }
  0x2d   : > { %7125 = vst [vmem:[#allocation15_spill] sm:$0xff] %v6131_v49  ;;  %v6137_v51 = vld [vmem:[%s5879_s11 + $0x169] sm:$0xff]  ;;  %v6151_v53 = vld [vmem:[%s5879_s11 + $0x171] sm:$0xff]  ;;  %v198_v55 = vld [vmem:[%s5879_s11] sm:$0xff] }
  0x2e   : > { %7126 = vst [vmem:[#allocation16_spill] sm:$0xff] %v6137_v51  ;;  %v6140_v52 = vld [vmem:[%s5879_s11 + $0xc2] sm:$0xff]  ;;  %7127 = vst [vmem:[#allocation17_spill] sm:$0xff] %v6151_v53  ;;  %v6154_v54 = vld [vmem:[%s5879_s11 + $0xca] sm:$0xff] }
  0x2f   : > { %4815 = vmatmul.mubr.msk.f32.gmra.mrb[8].mxu1 %vm264_vm1, %v5936_v15  ;;  %5015 = vmatmul.mubr.msk.f32.gmra.mrb[8].mxu0 %vm264_vm1, %v5950_v17  ;;  %v6158_v56 = vld [vmem:[%s5879_s11 + $0xda] sm:$0xff]  ;;  %v199_v57 = vld [vmem:[%s5879_s11 + $0x8] sm:$0xff]  ;;  %v6175_v60 = vld [vmem:[%s5879_s11 + $0xf2] sm:$0xff] }
  0x30   : > { %4817 = vmatprep.mubr.msk.f32.mxu1 %vm264_vm1, %v5939_v16  ;;  %5017 = vmatprep.mubr.msk.f32.mxu0 %vm264_vm1, %v5953_v18  ;;  %v6169_v58 = vld [vmem:[%s5879_s11 + $0xe2] sm:$0xff]  ;;  %v6172_v59 = vld [vmem:[%s5879_s11 + $0x18] sm:$0xff]  ;;  %v6198_v0 = vld [vmem:[%s5879_s11 + $0x30] sm:$0xff] }
  0x31   : > { %7128 = vst [vmem:[#allocation18_spill] sm:$0xff] %v6172_v59  ;;  %v6190_v62 = vld [vmem:[%s5879_s11 + $0x20] sm:$0xff]  ;;  %7130 = vst [vmem:[#allocation20_spill] sm:$0xff] %v6198_v0  ;;  %v6201_v2 = vld [vmem:[%s5879_s11 + $0x10a] sm:$0xff] }
  0x32   : > { %7129 = vst [vmem:[#allocation19_spill] sm:$0xff] %v6190_v62  ;;  %v6193_v63 = vld [vmem:[%s5879_s11 + $0xfa] sm:$0xff]  ;;  %v6217_v4 = vld [vmem:[%s5879_s11 + $0x112] sm:$0xff]  ;;  %v6220_v5 = vld [vmem:[%s5879_s11 + $0x48] sm:$0xff] }
  0x33   : > { %4818 = vmatmul.mubr.msk.f32.gmra.mrb[10].mxu1 %vm264_vm1, %v5950_v17  ;;  %5018 = vmatmul.mubr.msk.f32.gmra.mrb[10].mxu0 %vm264_vm1, %v5964_v19  ;;  %v6214_v3 = vld [vmem:[%s5879_s11 + $0x38] sm:$0xff]  ;;  %7132 = vst [vmem:[#allocation22_spill] sm:$0xff] %v6220_v5  ;;  %v6223_v6 = vld [vmem:[%s5879_s11 + $0x122] sm:$0xff]  ;;  %v6234_v7 = vld [vmem:[%s5879_s11 + $0x50] sm:$0xff] }
  0x34   : > { %4820 = vmatprep.mubr.msk.f32.mxu1 %vm264_vm1, %v5953_v18  ;;  %5020 = vmatprep.mubr.msk.f32.mxu0 %vm264_vm1, %v5967_v20  ;;  %7131 = vst [vmem:[#allocation21_spill] sm:$0xff] %v6214_v3  ;;  %7133 = vst [vmem:[#allocation23_spill] sm:$0xff] %v6234_v7 }
  0x37   : > { %4821 = vmatmul.mubr.msk.f32.gmra.mrb[12].mxu1 %vm264_vm1, %v5964_v19  ;;  %5021 = vmatmul.mubr.msk.f32.gmra.mrb[12].mxu0 %vm264_vm1, %v5978_v21 }
  0x38   : > { %4823 = vmatprep.mubr.msk.f32.mxu1 %vm264_vm1, %v5967_v20  ;;  %5023 = vmatprep.mubr.msk.f32.mxu0 %vm264_vm1, %v5981_v22 }
  0x3b   : > { %4824 = vmatmul.mubr.msk.f32.gmra.mrb[14].mxu1 %vm264_vm1, %v5978_v21  ;;  %5024 = vmatmul.mubr.msk.f32.gmra.mrb[14].mxu0 %vm264_vm1, %v5992_v23 }
  0x3c   : > { %4826 = vmatprep.mubr.msk.f32.mxu1 %vm264_vm1, %v5981_v22  ;;  %5052 = vmatprep.mubr.msk.f32.mxu0 %vm264_vm1, %v5995_v24 }
  0x3f   : > { %4827 = vmatmul.mubr.msk.f32.gmra.mrb[16].mxu1 %vm264_vm1, %v5992_v23  ;;  %5053 = vmatmul.mubr.msk.f32.vlgmr.msra.gmra.mrb[0].mxu0 %vm264_vm1, %v6006_v25 }
  0x40   : > { %5101 = vmatpush3.msk.msra.mxu0 %vm361_vm0, %v2504_v9  ;;  %4829 = vmatprep.mubr.msk.f32.mxu1 %vm264_vm1, %v6009_v26  ;;  %v6237_v9 = vld [vmem:[%s5879_s11 + $0x12a] sm:$0xff] }
  0x41   : > { %5055 = vmatprep.mubr.msk.f32.mxu0 %vm264_vm1, %v6012_v27  ;;  %5150 = vmatprep.subr.msk.mxu0 %vm361_vm0, %v6017_v28 }
  0x43   : > { %4830 = vmatmul.mubr.msk.f32.gmra.mrb[18].mxu1 %vm264_vm1, %v6027_v29  ;;  %5056 = vmatmul.mubr.msk.f32.gmra.mrb[2].mxu0 %vm264_vm1, %v6030_v30  ;;  %v6334_v29 = vld [vmem:[%s5879_s11 + $0xd8] sm:$0xff] }
  0x44   : > { %4832 = vmatprep.mubr.msk.f32.mxu1 %vm264_vm1, %v6035_v31  ;;  %5058 = vmatprep.mubr.msk.f32.mxu0 %vm264_vm1, %v6038_v32  ;;  %v6317_v31 = vld [vmem:[%s5879_s11 + $0x18a] sm:$0xff] }
  0x45   : > { %7144 = vst [vmem:[#allocation34_spill] sm:$0xff] %v6317_v31 }
  0x47   : > { %4833 = vmatmul.mubr.msk.f32.gmra.mrb[20].mxu1 %vm264_vm1, %v6051_v33  ;;  %5059 = vmatmul.mubr.msk.f32.gmra.mrb[4].mxu0 %vm264_vm1, %v6054_v34  ;;  %v6303_v33 = vld [vmem:[%s5879_s11 + $0x182] sm:$0xff] }
  0x48   : > { %4835 = vmatprep.mubr.msk.f32.mxu1 %vm264_vm1, %v6057_v35  ;;  %5061 = vmatprep.mubr.msk.f32.mxu0 %vm264_vm1, %v6060_v36  ;;  %v6300_v35 = vld [vmem:[%s5879_s11 + $0xa8] sm:$0xff]  ;;  %7142 = vst [vmem:[#allocation32_spill] sm:$0xff] %v6303_v33 }
  0x49   : > { %7141 = vst [vmem:[#allocation31_spill] sm:$0xff] %v6300_v35 }
  0x4b   : > { %4836 = vmatmul.mubr.msk.f32.gmra.mrb[22].mxu1 %vm264_vm1, %v6071_v37  ;;  %5062 = vmatmul.mubr.msk.f32.gmra.mrb[6].mxu0 %vm264_vm1, %v6074_v38  ;;  %v6297_v37 = vld [vmem:[%s5879_s11 + $0x172] sm:$0xff] }
  0x4c   : > { %4838 = vmatprep.mubr.msk.f32.mxu1 %vm264_vm1, %v6077_v39  ;;  %5064 = vmatprep.mubr.msk.f32.mxu0 %vm264_vm1, %v6080_v40  ;;  %v6294_v39 = vld [vmem:[%s5879_s11 + $0x98] sm:$0xff]  ;;  %7140 = vst [vmem:[#allocation30_spill] sm:$0xff] %v6297_v37 }
  0x4d   : > { %7139 = vst [vmem:[#allocation29_spill] sm:$0xff] %v6294_v39 }
  0x4f   : > { %4839 = vmatmul.mubr.msk.f32.gmra.mrb[24].mxu1 %vm264_vm1, %v6091_v41  ;;  %5065 = vmatmul.mubr.msk.f32.gmra.mrb[8].mxu0 %vm264_vm1, %v6094_v42  ;;  %v6283_v41 = vld [vmem:[%s5879_s11 + $0x16a] sm:$0xff] }
  0x50   : > { %4841 = vmatprep.mubr.msk.f32.mxu1 %vm264_vm1, %v6097_v43  ;;  %5067 = vmatprep.mubr.msk.f32.mxu0 %vm264_vm1, %v6100_v44  ;;  %v6280_v43 = vld [vmem:[%s5879_s11 + $0x90] sm:$0xff] }
  0x51   : > { %7138 = vst [vmem:[#allocation28_spill] sm:$0xff] %v6280_v43 }
  0x53   : > { %4842 = vmatmul.mubr.msk.f32.gmra.mrb[26].mxu1 %vm264_vm1, %v6111_v45  ;;  %5068 = vmatmul.mubr.msk.f32.gmra.mrb[10].mxu0 %vm264_vm1, %v6114_v46  ;;  %v6277_v45 = vld [vmem:[%s5879_s11 + $0x15a] sm:$0xff] }
  0x54   : > { %4844 = vmatprep.mubr.msk.f32.mxu1 %vm264_vm1, %v6117_v47  ;;  %5070 = vmatprep.mubr.msk.f32.mxu0 %vm264_vm1, %v6120_v48  ;;  %v6274_v47 = vld [vmem:[%s5879_s11 + $0x80] sm:$0xff] }
  0x55   : > { %7137 = vst [vmem:[#allocation27_spill] sm:$0xff] %v6274_v47 }
  0x57   : > { %4845 = vmatmul.mubr.msk.f32.gmra.mrb[28].mxu1 %vm264_vm1, %v6131_v49  ;;  %5071 = vmatmul.mubr.msk.f32.gmra.mrb[12].mxu0 %vm264_vm1, %v6134_v50  ;;  %v6263_v49 = vld [vmem:[%s5879_s11 + $0x152] sm:$0xff] }
  0x58   : > { %4847 = vmatprep.mubr.msk.f32.mxu1 %vm264_vm1, %v6137_v51  ;;  %5073 = vmatprep.mubr.msk.f32.mxu0 %vm264_vm1, %v6140_v52  ;;  %v6260_v51 = vld [vmem:[%s5879_s11 + $0x78] sm:$0xff] }
  0x59   : > { %7136 = vst [vmem:[#allocation26_spill] sm:$0xff] %v6260_v51 }
  0x5b   : > { %4848 = vmatmul.mubr.msk.f32.gmra.mrb[30].mxu1 %vm264_vm1, %v6151_v53  ;;  %5074 = vmatmul.mubr.msk.f32.gmra.mrb[14].mxu0 %vm264_vm1, %v6154_v54  ;;  %v6257_v53 = vld [vmem:[%s5879_s11 + $0x142] sm:$0xff] }
  0x5c   : > { %4852 = vmatprep.mubr.msk.f32.mxu1 %vm264_vm1, %v198_v55  ;;  %5076 = vmatprep.mubr.msk.f32.mxu0 %vm264_vm1, %v6158_v56  ;;  %v6243_v55 = vld [vmem:[%s5879_s11 + $0x13a] sm:$0xff] }
  0x5f   : > { %4853 = vmatmul.mubr.msk.f32.vlgmr.msra.gmra.mrb[0].mxu1 %vm264_vm1, %v199_v57  ;;  %5077 = vmatmul.mubr.msk.f32.gmra.mrb[16].mxu0 %vm264_vm1, %v6169_v58  ;;  %v6254_v57 = vld [vmem:[%s5879_s11 + $0x68] sm:$0xff] }
  0x60   : > { %4901 = vmatpush3.msk.msra.mxu1 %vm361_vm0, %v5898_v10  ;;  %4855 = vmatprep.mubr.msk.f32.mxu1 %vm264_vm1, %v6172_v59  ;;  %v6240_v10 = vld [vmem:[%s5879_s11 + $0x60] sm:$0xff]  ;;  %7135 = vst [vmem:[#allocation25_spill] sm:$0xff] %v6254_v57 }
  0x61   : > { %5079 = vmatprep.mubr.msk.f32.mxu0 %vm264_vm1, %v6175_v60  ;;  %4950 = vmatprep.subr.msk.mxu1 %vm361_vm0, %v6180_v61  ;;  %7134 = vst [vmem:[#allocation24_spill] sm:$0xff] %v6240_v10  ;;  %v6320_v59 = vld [vmem:[%s5879_s11 + $0xc0] sm:$0xff] }
  0x63   : > { %4856 = vmatmul.mubr.msk.f32.gmra.mrb[2].mxu1 %vm264_vm1, %v6190_v62  ;;  %5080 = vmatmul.mubr.msk.f32.gmra.mrb[18].mxu0 %vm264_vm1, %v6193_v63  ;;  %v6314_v62 = vld [vmem:[%s5879_s11 + $0xb0] sm:$0xff] }
  0x64   : > { %4858 = vmatprep.mubr.msk.f32.mxu1 %vm264_vm1, %v6198_v0  ;;  %5082 = vmatprep.mubr.msk.f32.mxu0 %vm264_vm1, %v6201_v2  ;;  %7143 = vst [vmem:[#allocation33_spill] sm:$0xff] %v6314_v62 }
  0x67   : > { %4859 = vmatmul.mubr.msk.f32.gmra.mrb[4].mxu1 %vm264_vm1, %v6214_v3  ;;  %5083 = vmatmul.mubr.msk.f32.gmra.mrb[20].mxu0 %vm264_vm1, %v6217_v4 }
  0x68   : > { %4861 = vmatprep.mubr.msk.f32.mxu1 %vm264_vm1, %v6220_v5  ;;  %5085 = vmatprep.mubr.msk.f32.mxu0 %vm264_vm1, %v6223_v6 }
  0x6b   : > { %4862 = vmatmul.mubr.msk.f32.gmra.mrb[6].mxu1 %vm264_vm1, %v6234_v7  ;;  %5086 = vmatmul.mubr.msk.f32.gmra.mrb[22].mxu0 %vm264_vm1, %v6237_v9 }
  0x6c   : > { %4864 = vmatprep.mubr.msk.f32.mxu1 %vm264_vm1, %v6240_v10  ;;  %5088 = vmatprep.mubr.msk.f32.mxu0 %vm264_vm1, %v6243_v55 }
  0x6f   : > { %4865 = vmatmul.mubr.msk.f32.gmra.mrb[8].mxu1 %vm264_vm1, %v6254_v57  ;;  %5089 = vmatmul.mubr.msk.f32.gmra.mrb[24].mxu0 %vm264_vm1, %v6257_v53 }
  0x70   : > { %4867 = vmatprep.mubr.msk.f32.mxu1 %vm264_vm1, %v6260_v51  ;;  %5091 = vmatprep.mubr.msk.f32.mxu0 %vm264_vm1, %v6263_v49 }
  0x73   : > { %4868 = vmatmul.mubr.msk.f32.gmra.mrb[10].mxu1 %vm264_vm1, %v6274_v47  ;;  %5092 = vmatmul.mubr.msk.f32.gmra.mrb[26].mxu0 %vm264_vm1, %v6277_v45 }
  0x74   : > { %4870 = vmatprep.mubr.msk.f32.mxu1 %vm264_vm1, %v6280_v43  ;;  %5094 = vmatprep.mubr.msk.f32.mxu0 %vm264_vm1, %v6283_v41 }
  0x77   : > { %4871 = vmatmul.mubr.msk.f32.gmra.mrb[12].mxu1 %vm264_vm1, %v6294_v39  ;;  %5095 = vmatmul.mubr.msk.f32.gmra.mrb[28].mxu0 %vm264_vm1, %v6297_v37  ;;  %v6339_v37 = vld [vmem:[%s7065_s1 + $0x20] sm:$0xf] }
  0x78   : > { %4873 = vmatprep.mubr.msk.f32.mxu1 %vm264_vm1, %v6300_v35  ;;  %5097 = vmatprep.mubr.msk.f32.mxu0 %vm264_vm1, %v6303_v33  ;;  %v6331_v33 = vld [vmem:[%s5879_s11 + $0xc8] sm:$0xff] }
  0x79   : > { %7145 = vst [vmem:[#allocation35_spill] sm:$0xff] %v6331_v33 }
  0x7b   : > { %4874 = vmatmul.mubr.msk.f32.gmra.mrb[14].mxu1 %vm264_vm1, %v6314_v62  ;;  %5098 = vmatmul.mubr.msk.f32.gmra.mrb[30].mxu0 %vm264_vm1, %v6317_v31  ;;  %v6350_v31 = vld [vmem:[%s5879_s11 + $0xe0] sm:$0xff] }
  0x7c   : > { %4876 = vmatprep.mubr.msk.f32.mxu1 %vm264_vm1, %v6320_v59  ;;  %5102 = vmatprep.mubr.msk.f32.mxu0 %vm264_vm1, %v6198_v0  ;;  %v6355_v0 = vld [vmem:[%s5879_s11 + $0xf0] sm:$0xff] }
  0x7f   : > { %4877 = vmatmul.mubr.msk.f32.gmra.mrb[16].mxu1 %vm264_vm1, %v6331_v33  ;;  %5103 = vmatmul.mubr.msk.f32.vlgmr.msra.gmra.mrb[0].mxu0 %vm264_vm1, %v6214_v3  ;;  %v914_v3 = vld [vmem:[%s5879_s11 + $0x2] sm:$0xff] }
  0x80   : > { %5151 = vmatpush3.msk.msra.mxu0 %vm361_vm0, %v6017_v28  ;;  %4879 = vmatprep.mubr.msk.f32.mxu1 %vm264_vm1, %v6334_v29  ;;  %v6368_v28 = vld [vmem:[%s5879_s11 + $0xf8] sm:$0xff] }
  0x81   : > { %5105 = vmatprep.mubr.msk.f32.mxu0 %vm264_vm1, %v6220_v5  ;;  %5200 = vmatprep.subr.msk.mxu0 %vm361_vm0, %v6339_v37  ;;  %v6371_v5 = vld [vmem:[%s5879_s11 + $0x108] sm:$0xff] }
  0x83   : > { %4880 = vmatmul.mubr.msk.f32.gmra.mrb[18].mxu1 %vm264_vm1, %v6350_v31  ;;  %5106 = vmatmul.mubr.msk.f32.gmra.mrb[2].mxu0 %vm264_vm1, %v6234_v7  ;;  %v6382_v7 = vld [vmem:[%s5879_s11 + $0x110] sm:$0xff] }
  0x84   : > { %4882 = vmatprep.mubr.msk.f32.mxu1 %vm264_vm1, %v6355_v0  ;;  %5108 = vmatprep.mubr.msk.f32.mxu0 %vm264_vm1, %v6240_v10  ;;  %v6385_v10 = vld [vmem:[%s5879_s11 + $0x120] sm:$0xff] }
  0x87   : > { %4883 = vmatmul.mubr.msk.f32.gmra.mrb[20].mxu1 %vm264_vm1, %v6368_v28  ;;  %5109 = vmatmul.mubr.msk.f32.gmra.mrb[4].mxu0 %vm264_vm1, %v6254_v57  ;;  %v6396_v57 = vld [vmem:[%s5879_s11 + $0x128] sm:$0xff] }
  0x88   : > { %4885 = vmatprep.mubr.msk.f32.mxu1 %vm264_vm1, %v6371_v5  ;;  %5111 = vmatprep.mubr.msk.f32.mxu0 %vm264_vm1, %v6260_v51  ;;  %v6399_v51 = vld [vmem:[%s5879_s11 + $0x138] sm:$0xff] }
  0x8b   : > { %4886 = vmatmul.mubr.msk.f32.gmra.mrb[22].mxu1 %vm264_vm1, %v6382_v7  ;;  %5112 = vmatmul.mubr.msk.f32.gmra.mrb[6].mxu0 %vm264_vm1, %v6274_v47  ;;  %v6410_v47 = vld [vmem:[%s5879_s11 + $0x140] sm:$0xff] }
  0x8c   : > { %4888 = vmatprep.mubr.msk.f32.mxu1 %vm264_vm1, %v6385_v10  ;;  %5114 = vmatprep.mubr.msk.f32.mxu0 %vm264_vm1, %v6280_v43  ;;  %v6413_v43 = vld [vmem:[%s5879_s11 + $0x150] sm:$0xff] }
  0x8f   : > { %4889 = vmatmul.mubr.msk.f32.gmra.mrb[24].mxu1 %vm264_vm1, %v6396_v57  ;;  %5115 = vmatmul.mubr.msk.f32.gmra.mrb[8].mxu0 %vm264_vm1, %v6294_v39  ;;  %v6424_v39 = vld [vmem:[%s5879_s11 + $0x158] sm:$0xff] }
  0x90   : > { %4891 = vmatprep.mubr.msk.f32.mxu1 %vm264_vm1, %v6399_v51  ;;  %5117 = vmatprep.mubr.msk.f32.mxu0 %vm264_vm1, %v6300_v35  ;;  %v6427_v35 = vld [vmem:[%s5879_s11 + $0x168] sm:$0xff] }
  0x93   : > { %4892 = vmatmul.mubr.msk.f32.gmra.mrb[26].mxu1 %vm264_vm1, %v6410_v47  ;;  %5118 = vmatmul.mubr.msk.f32.gmra.mrb[10].mxu0 %vm264_vm1, %v6314_v62  ;;  %v6438_v62 = vld [vmem:[%s5879_s11 + $0x170] sm:$0xff] }
  0x94   : > { %4894 = vmatprep.mubr.msk.f32.mxu1 %vm264_vm1, %v6413_v43  ;;  %5120 = vmatprep.mubr.msk.f32.mxu0 %vm264_vm1, %v6320_v59 }
  0x97   : > { %4895 = vmatmul.mubr.msk.f32.gmra.mrb[28].mxu1 %vm264_vm1, %v6424_v39  ;;  %5121 = vmatmul.mubr.msk.f32.gmra.mrb[12].mxu0 %vm264_vm1, %v6331_v33  ;;  %v915_v33 = vld [vmem:[%s5879_s11 + $0xa] sm:$0xff] }
  0x98   : > { %4897 = vmatprep.mubr.msk.f32.mxu1 %vm264_vm1, %v6427_v35  ;;  %5123 = vmatprep.mubr.msk.f32.mxu0 %vm264_vm1, %v6334_v29 }
  0x9b   : > { %4898 = vmatmul.mubr.msk.f32.gmra.mrb[30].mxu1 %vm264_vm1, %v6438_v62  ;;  %5124 = vmatmul.mubr.msk.f32.gmra.mrb[14].mxu0 %vm264_vm1, %v6350_v31 }
  0x9c   : > { %4902 = vmatprep.mubr.msk.f32.mxu1 %vm264_vm1, %v914_v3  ;;  %5126 = vmatprep.mubr.msk.f32.mxu0 %vm264_vm1, %v6355_v0  ;;  %v7162_v3 = vld [vmem:[#allocation25_spill] sm:$0xff] }
  0x9f   : > { %4903 = vmatmul.mubr.msk.f32.vlgmr.msra.gmra.mrb[0].mxu1 %vm264_vm1, %v915_v33  ;;  %5127 = vmatmul.mubr.msk.f32.gmra.mrb[16].mxu0 %vm264_vm1, %v6368_v28  ;;  %v4331_v33 = vld [vmem:[%s5879_s11 + $0x198] sm:$0xff] }
  0xa0   : > { %4951 = vmatpush3.msk.msra.mxu1 %vm361_vm0, %v6180_v61  ;;  %4905 = vmatprep.mubr.msk.f32.mxu1 %vm264_vm1, %v5995_v24  ;;  %v6493_v24 = vld [vmem:[%s5879_s11 + $0x180] sm:$0xff] }
  0xa1   : > { %5129 = vmatprep.mubr.msk.f32.mxu0 %vm264_vm1, %v6371_v5  ;;  %5250 = vmatprep.subr.msk.mxu1 %vm361_vm0, %v5858_v1  ;;  %v4332_v61 = vld [vmem:[%s5879_s11 + $0x1a0] sm:$0xff] }
  0xa3   : > { %4906 = vmatmul.mubr.msk.f32.gmra.mrb[2].mxu1 %vm264_vm1, %v6006_v25  ;;  %5130 = vmatmul.mubr.msk.f32.gmra.mrb[18].mxu0 %vm264_vm1, %v6382_v7  ;;  %v6504_v25 = vld [vmem:[%s5879_s11 + $0x188] sm:$0xff] }
  0xa4   : > { %4908 = vmatprep.mubr.msk.f32.mxu1 %vm264_vm1, %v6012_v27  ;;  %5132 = vmatprep.mubr.msk.f32.mxu0 %vm264_vm1, %v6385_v10 }
  0xa7   : > { %4909 = vmatmul.mubr.msk.f32.gmra.mrb[4].mxu1 %vm264_vm1, %v6030_v30  ;;  %5133 = vmatmul.mubr.msk.f32.gmra.mrb[20].mxu0 %vm264_vm1, %v6396_v57 }
  0xa8   : > { %4911 = vmatprep.mubr.msk.f32.mxu1 %vm264_vm1, %v6038_v32  ;;  %5135 = vmatprep.mubr.msk.f32.mxu0 %vm264_vm1, %v6399_v51 }
  0xab   : > { %4912 = vmatmul.mubr.msk.f32.gmra.mrb[6].mxu1 %vm264_vm1, %v6054_v34  ;;  %5136 = vmatmul.mubr.msk.f32.gmra.mrb[22].mxu0 %vm264_vm1, %v6410_v47 }
  0xac   : > { %4914 = vmatprep.mubr.msk.f32.mxu1 %vm264_vm1, %v6060_v36  ;;  %5138 = vmatprep.mubr.msk.f32.mxu0 %vm264_vm1, %v6413_v43 }
  0xaf   : > { %4915 = vmatmul.mubr.msk.f32.gmra.mrb[8].mxu1 %vm264_vm1, %v6074_v38  ;;  %5139 = vmatmul.mubr.msk.f32.gmra.mrb[24].mxu0 %vm264_vm1, %v6424_v39 }
  0xb0   : > { %4917 = vmatprep.mubr.msk.f32.mxu1 %vm264_vm1, %v6080_v40  ;;  %5141 = vmatprep.mubr.msk.f32.mxu0 %vm264_vm1, %v6427_v35 }
  0xb3   : > { %4918 = vmatmul.mubr.msk.f32.gmra.mrb[10].mxu1 %vm264_vm1, %v6094_v42  ;;  %5142 = vmatmul.mubr.msk.f32.gmra.mrb[26].mxu0 %vm264_vm1, %v6438_v62 }
  0xb4   : > { %4920 = vmatprep.mubr.msk.f32.mxu1 %vm264_vm1, %v6100_v44  ;;  %5144 = vmatprep.mubr.msk.f32.mxu0 %vm264_vm1, %v6493_v24 }
  0xb7   : > { %4921 = vmatmul.mubr.msk.f32.gmra.mrb[12].mxu1 %vm264_vm1, %v6114_v46  ;;  %5145 = vmatmul.mubr.msk.f32.gmra.mrb[28].mxu0 %vm264_vm1, %v6504_v25 }
  0xb8   : > { %4923 = vmatprep.mubr.msk.f32.mxu1 %vm264_vm1, %v6120_v48  ;;  %5147 = vmatprep.mubr.msk.f32.mxu0 %vm264_vm1, %v4331_v33  ;;  %v7163_v33 = vld [vmem:[#allocation13_spill] sm:$0xff] }
  0xbb   : > { %4924 = vmatmul.mubr.msk.f32.gmra.mrb[14].mxu1 %vm264_vm1, %v6134_v50  ;;  %5148 = vmatmul.mubr.msk.f32.gmra.mrb[30].mxu0 %vm264_vm1, %v4332_v61  ;;  %v7164_v61 = vld [vmem:[#allocation26_spill] sm:$0xff] }
  0xbc   : > { %4926 = vmatprep.mubr.msk.f32.mxu1 %vm264_vm1, %v6140_v52  ;;  %5152 = vmatprep.mubr.msk.f32.mxu0 %vm264_vm1, %v5888_v8  ;;  %v7146_v8 = vld [vmem:[#allocation30_spill] sm:$0xff] }
  0xbf   : > { %4927 = vmatmul.mubr.msk.f32.gmra.mrb[16].mxu1 %vm264_vm1, %v6154_v54  ;;  %5153 = vmatmul.mubr.msk.f32.vlgmr.msra.gmra.mrb[0].mxu0 %vm264_vm1, %v5903_v11  ;;  %v7147_v11 = vld [vmem:[#allocation5_spill] sm:$0xff] }
  0xc0   : > { %5201 = vmatpush3.msk.msra.mxu0 %vm361_vm0, %v6339_v37  ;;  %4929 = vmatprep.mubr.msk.f32.mxu1 %vm264_vm1, %v6158_v56  ;;  %v7161_v37 = vld [vmem:[#allocation12_spill] sm:$0xff] }
  0xc1   : > { %5155 = vmatprep.mubr.msk.f32.mxu0 %vm264_vm1, %v5909_v12  ;;  %v7148_v12 = vld [vmem:[#allocation18_spill] sm:$0xff] }
  0xc3   : > { %4930 = vmatmul.mubr.msk.f32.gmra.mrb[18].mxu1 %vm264_vm1, %v6169_v58  ;;  %5156 = vmatmul.mubr.msk.f32.gmra.mrb[2].mxu0 %vm264_vm1, %v5922_v13  ;;  %v7149_v13 = vld [vmem:[#allocation6_spill] sm:$0xff] }
  0xc4   : > { %4932 = vmatprep.mubr.msk.f32.mxu1 %vm264_vm1, %v6175_v60  ;;  %5158 = vmatprep.mubr.msk.f32.mxu0 %vm264_vm1, %v5925_v14  ;;  %v7150_v14 = vld [vmem:[#allocation19_spill] sm:$0xff] }
  0xc7   : > { %4933 = vmatmul.mubr.msk.f32.gmra.mrb[20].mxu1 %vm264_vm1, %v6193_v63  ;;  %5159 = vmatmul.mubr.msk.f32.gmra.mrb[4].mxu0 %vm264_vm1, %v5936_v15  ;;  %v7151_v15 = vld [vmem:[#allocation7_spill] sm:$0xff] }
  0xc8   : > { %4935 = vmatprep.mubr.msk.f32.mxu1 %vm264_vm1, %v6201_v2  ;;  %5161 = vmatprep.mubr.msk.f32.mxu0 %vm264_vm1, %v5939_v16  ;;  %v7152_v16 = vld [vmem:[#allocation20_spill] sm:$0xff] }
  0xcb   : > { %4936 = vmatmul.mubr.msk.f32.gmra.mrb[22].mxu1 %vm264_vm1, %v6217_v4  ;;  %5162 = vmatmul.mubr.msk.f32.gmra.mrb[6].mxu0 %vm264_vm1, %v5950_v17  ;;  %v7153_v17 = vld [vmem:[#allocation8_spill] sm:$0xff] }
  0xcc   : > { %4938 = vmatprep.mubr.msk.f32.mxu1 %vm264_vm1, %v6223_v6  ;;  %5164 = vmatprep.mubr.msk.f32.mxu0 %vm264_vm1, %v5953_v18  ;;  %v7154_v18 = vld [vmem:[#allocation21_spill] sm:$0xff] }
  0xcf   : > { %4939 = vmatmul.mubr.msk.f32.gmra.mrb[24].mxu1 %vm264_vm1, %v6237_v9  ;;  %5165 = vmatmul.mubr.msk.f32.gmra.mrb[8].mxu0 %vm264_vm1, %v5964_v19  ;;  %v7155_v19 = vld [vmem:[#allocation9_spill] sm:$0xff] }
  0xd0   : > { %4941 = vmatprep.mubr.msk.f32.mxu1 %vm264_vm1, %v6243_v55  ;;  %5167 = vmatprep.mubr.msk.f32.mxu0 %vm264_vm1, %v5967_v20  ;;  %v7156_v20 = vld [vmem:[#allocation22_spill] sm:$0xff] }
  0xd3   : > { %4942 = vmatmul.mubr.msk.f32.gmra.mrb[26].mxu1 %vm264_vm1, %v6257_v53  ;;  %5168 = vmatmul.mubr.msk.f32.gmra.mrb[10].mxu0 %vm264_vm1, %v5978_v21  ;;  %v7157_v21 = vld [vmem:[#allocation10_spill] sm:$0xff] }
  0xd4   : > { %4944 = vmatprep.mubr.msk.f32.mxu1 %vm264_vm1, %v6263_v49  ;;  %5170 = vmatprep.mubr.msk.f32.mxu0 %vm264_vm1, %v5981_v22  ;;  %v7159_v22 = vld [vmem:[#allocation11_spill] sm:$0xff] }
  0xd7   : > { %4945 = vmatmul.mubr.msk.f32.gmra.mrb[28].mxu1 %vm264_vm1, %v6277_v45  ;;  %5171 = vmatmul.mubr.msk.f32.gmra.mrb[12].mxu0 %vm264_vm1, %v5992_v23  ;;  %v7160_v23 = vld [vmem:[#allocation24_spill] sm:$0xff] }
  0xd8   : > { %4947 = vmatprep.mubr.msk.f32.mxu1 %vm264_vm1, %v6283_v41  ;;  %5173 = vmatprep.mubr.msk.f32.mxu0 %vm264_vm1, %v6009_v26 }
  0xdb   : > { %4948 = vmatmul.mubr.msk.f32.gmra.mrb[30].mxu1 %vm264_vm1, %v7146_v8  ;;  %5174 = vmatmul.mubr.msk.f32.gmra.mrb[14].mxu0 %vm264_vm1, %v7147_v11  ;;  %v7173_v8 = vld [vmem:[#allocation33_spill] sm:$0xff] }
  0xdc   : > { %4952 = vmatprep.mubr.msk.f32.mxu1 %vm264_vm1, %v7148_v12  ;;  %5176 = vmatprep.mubr.msk.f32.mxu0 %vm264_vm1, %v7149_v13  ;;  %v7165_v12 = vld [vmem:[#allocation14_spill] sm:$0xff] }
  0xdf   : > { %4953 = vmatmul.mubr.msk.f32.vlgmr.msra.gmra.mrb[0].mxu1 %vm264_vm1, %v7150_v14  ;;  %5177 = vmatmul.mubr.msk.f32.gmra.mrb[16].mxu0 %vm264_vm1, %v7151_v15  ;;  %v7166_v14 = vld [vmem:[#allocation27_spill] sm:$0xff] }
  0xe0   : > { %5251 = vmatpush3.msk.msra.mxu1 %vm361_vm0, %v5858_v1  ;;  %4955 = vmatprep.mubr.msk.f32.mxu1 %vm264_vm1, %v7152_v16  ;;  %v7158_v1 = vld [vmem:[#allocation23_spill] sm:$0xff] }
  0xe1   : > { %5179 = vmatprep.mubr.msk.f32.mxu0 %vm264_vm1, %v7153_v17  ;;  %v7167_v16 = vld [vmem:[#allocation15_spill] sm:$0xff] }
  0xe3   : > { %4956 = vmatmul.mubr.msk.f32.gmra.mrb[2].mxu1 %vm264_vm1, %v7154_v18  ;;  %5180 = vmatmul.mubr.msk.f32.gmra.mrb[18].mxu0 %vm264_vm1, %v7155_v19  ;;  %v7168_v18 = vld [vmem:[#allocation28_spill] sm:$0xff] }
  0xe4   : > { %4958 = vmatprep.mubr.msk.f32.mxu1 %vm264_vm1, %v7156_v20  ;;  %5182 = vmatprep.mubr.msk.f32.mxu0 %vm264_vm1, %v7157_v21  ;;  %v7169_v20 = vld [vmem:[#allocation16_spill] sm:$0xff] }
  0xe7   : > { %4959 = vmatmul.mubr.msk.f32.gmra.mrb[4].mxu1 %vm264_vm1, %v7158_v1  ;;  %5183 = vmatmul.mubr.msk.f32.gmra.mrb[20].mxu0 %vm264_vm1, %v7159_v22  ;;  %v6631_v1 = vld [vmem:[%s5879_s11 + $0x181] sm:$0xff] }
  0xe8   : > { %4961 = vmatprep.mubr.msk.f32.mxu1 %vm264_vm1, %v7160_v23  ;;  %5185 = vmatprep.mubr.msk.f32.mxu0 %vm264_vm1, %v7161_v37  ;;  %v7170_v23 = vld [vmem:[#allocation29_spill] sm:$0xff] }
  0xeb   : > { %4962 = vmatmul.mubr.msk.f32.gmra.mrb[6].mxu1 %vm264_vm1, %v7162_v3  ;;  %5186 = vmatmul.mubr.msk.f32.gmra.mrb[22].mxu0 %vm264_vm1, %v7163_v33  ;;  %v7171_v3 = vld [vmem:[#allocation17_spill] sm:$0xff] }
  0xec   : > { %4964 = vmatprep.mubr.msk.f32.mxu1 %vm264_vm1, %v7164_v61  ;;  %5188 = vmatprep.mubr.msk.f32.mxu0 %vm264_vm1, %v7165_v12  ;;  %v7172_v61 = vld [vmem:[#allocation31_spill] sm:$0xff] }
  0xef   : > { %4965 = vmatmul.mubr.msk.f32.gmra.mrb[8].mxu1 %vm264_vm1, %v7166_v14  ;;  %5189 = vmatmul.mubr.msk.f32.gmra.mrb[24].mxu0 %vm264_vm1, %v7167_v16  ;;  %v6642_v14 = vld [vmem:[%s5879_s11 + $0x189] sm:$0xff] }
  0xf0   : > { %4967 = vmatprep.mubr.msk.f32.mxu1 %vm264_vm1, %v7168_v18  ;;  %5191 = vmatprep.mubr.msk.f32.mxu0 %vm264_vm1, %v7169_v20  ;;  %v4396_v18 = vld [vmem:[%s5879_s11 + $0x199] sm:$0xff] }
  0xf3   : > { %4968 = vmatmul.mubr.msk.f32.gmra.mrb[10].mxu1 %vm264_vm1, %v7170_v23  ;;  %5192 = vmatmul.mubr.msk.f32.gmra.mrb[26].mxu0 %vm264_vm1, %v7171_v3  ;;  %v4397_v23 = vld [vmem:[%s5879_s11 + $0x1a1] sm:$0xff]  ;;  %v7174_v3 = vld [vmem:[#allocation35_spill] sm:$0xff] }
  0xf4   : > { %4970 = vmatprep.mubr.msk.f32.mxu1 %vm264_vm1, %v7172_v61  ;;  %5194 = vmatprep.mubr.msk.f32.mxu0 %vm264_vm1, %v6631_v1 }
  0xf7   : > { %4971 = vmatmul.mubr.msk.f32.gmra.mrb[12].mxu1 %vm264_vm1, %v7173_v8  ;;  %5195 = vmatmul.mubr.msk.f32.gmra.mrb[28].mxu0 %vm264_vm1, %v6642_v14 }
  0xf8   : > { %4973 = vmatprep.mubr.msk.f32.mxu1 %vm264_vm1, %v6320_v59  ;;  %5197 = vmatprep.mubr.msk.f32.mxu0 %vm264_vm1, %v4396_v18 }
  0xfb   : > { %4974 = vmatmul.mubr.msk.f32.gmra.mrb[14].mxu1 %vm264_vm1, %v7174_v3  ;;  %5198 = vmatmul.mubr.msk.f32.gmra.mrb[30].mxu0 %vm264_vm1, %v4397_v23 }
  0xfc   : > { %4976 = vmatprep.mubr.msk.f32.mxu1 %vm264_vm1, %v6334_v29  ;;  %5202 = vmatprep.mubr.msk.f32.mxu0 %vm264_vm1, %v6012_v27  ;;  %v7176_v27 = vld [vmem:[#allocation32_spill] sm:$0xff] }
  0xfd   : > { %v4461_v29 = vld [vmem:[%s5879_s11 + $0x19a] sm:$0xff] }
  0xff   : > { %4977 = vmatmul.mubr.msk.f32.gmra.mrb[16].mxu1 %vm264_vm1, %v6350_v31  ;;  %5203 = vmatmul.mubr.msk.f32.vlgmr.msra.gmra.mrb[0].mxu0 %vm264_vm1, %v6030_v30  ;;  %v7177_v30 = vld [vmem:[#allocation17_spill] sm:$0xff]  ;;  %v7178_v31 = vld [vmem:[#allocation34_spill] sm:$0xff] }
 0x100   : > { %4979 = vmatprep.mubr.msk.f32.mxu1 %vm264_vm1, %v6355_v0  ;;  %5205 = vmatprep.mubr.msk.f32.mxu0 %vm264_vm1, %v6038_v32  ;;  %v4462_v32 = vld [vmem:[%s5879_s11 + $0x1a2] sm:$0xff]  ;;  %s3918_s11 = sshll.u32 %s6879_s9, 4  ;;  %s7012_s11 = int_to_ptr.vmem [resolvable:$true] %s3918_s11 }
 0x101   : > { %s5694_s23 = scalar_lea.vmem %s7012_s11, 4096  ;;  %p5701_p1 = scmp.lt.s32.totalorder %s7012_s11, %s5699_s27 }
 0x102   : > { %p5695_p12 = scmp.ne.s32.totalorder %s7012_s11, %s5694_s23  ;;  %p5702_p2 = scmp.lt.s32.totalorder %s5700_s28, %s5694_s23 }
 0x103   : > { %4980 = vmatmul.mubr.msk.f32.gmra.mrb[18].mxu1 %vm264_vm1, %v6368_v28  ;;  %5206 = vmatmul.mubr.msk.f32.gmra.mrb[2].mxu0 %vm264_vm1, %v6054_v34 }
 0x104   : > { %4982 = vmatprep.mubr.msk.f32.mxu1 %vm264_vm1, %v6371_v5  ;;  %5208 = vmatprep.mubr.msk.f32.mxu0 %vm264_vm1, %v6060_v36  ;;  %p5696_p13 = pnand %p5695_p12, %p5837_p4  ;;  %p5703_p3 = por %p5702_p2, %p5701_p1 }
 0x106   : > { %p5697_p0 = pneg %p5696_p13 }
 0x107   : > { %4983 = vmatmul.mubr.msk.f32.gmra.mrb[20].mxu1 %vm264_vm1, %v6382_v7  ;;  %5209 = vmatmul.mubr.msk.f32.gmra.mrb[4].mxu0 %vm264_vm1, %v6074_v38 }
 0x108   : > { %4985 = vmatprep.mubr.msk.f32.mxu1 %vm264_vm1, %v6385_v10  ;;  %5211 = vmatprep.mubr.msk.f32.mxu0 %vm264_vm1, %v6080_v40  ;;  %p5704_p5 = pnand %p5703_p3, %p5697_p0 }
 0x10b   : > { %4986 = vmatmul.mubr.msk.f32.gmra.mrb[22].mxu1 %vm264_vm1, %v6396_v57  ;;  %5212 = vmatmul.mubr.msk.f32.gmra.mrb[6].mxu0 %vm264_vm1, %v6094_v42 }
 0x10c   : > { %4988 = vmatprep.mubr.msk.f32.mxu1 %vm264_vm1, %v6399_v51  ;;  %5214 = vmatprep.mubr.msk.f32.mxu0 %vm264_vm1, %v6100_v44 }
 0x10f   : > { %4989 = vmatmul.mubr.msk.f32.gmra.mrb[24].mxu1 %vm264_vm1, %v6410_v47  ;;  %5215 = vmatmul.mubr.msk.f32.gmra.mrb[8].mxu0 %vm264_vm1, %v6114_v46 }
 0x110   : > { %4991 = vmatprep.mubr.msk.f32.mxu1 %vm264_vm1, %v6413_v43  ;;  %5217 = vmatprep.mubr.msk.f32.mxu0 %vm264_vm1, %v6120_v48 }
 0x113   : > { %4992 = vmatmul.mubr.msk.f32.gmra.mrb[26].mxu1 %vm264_vm1, %v6424_v39  ;;  %5218 = vmatmul.mubr.msk.f32.gmra.mrb[10].mxu0 %vm264_vm1, %v6134_v50 }
 0x114   : > { %4994 = vmatprep.mubr.msk.f32.mxu1 %vm264_vm1, %v6427_v35  ;;  %5220 = vmatprep.mubr.msk.f32.mxu0 %vm264_vm1, %v6140_v52  ;;  %v6799_v52 = vld [vmem:[%s7066_s2] ss:$0 sm:$0xff] }
 0x117   : > { %4995 = vmatmul.mubr.msk.f32.gmra.mrb[28].mxu1 %vm264_vm1, %v6438_v62  ;;  %5221 = vmatmul.mubr.msk.f32.gmra.mrb[12].mxu0 %vm264_vm1, %v6154_v54 }
 0x118   : > { %4997 = vmatprep.mubr.msk.f32.mxu1 %vm264_vm1, %v6493_v24  ;;  %5223 = vmatprep.mubr.msk.f32.mxu0 %vm264_vm1, %v6158_v56 }
 0x11b   : > { %4998 = vmatmul.mubr.msk.f32.gmra.mrb[30].mxu1 %vm264_vm1, %v6504_v25  ;;  %5224 = vmatmul.mubr.msk.f32.gmra.mrb[14].mxu0 %vm264_vm1, %v6169_v58 }
 0x11c   : > { %5026 = vmatprep.mubr.msk.f32.mxu1 %vm264_vm1, %v6009_v26  ;;  %5226 = vmatprep.mubr.msk.f32.mxu0 %vm264_vm1, %v6175_v60  ;;  %v7175_v26 = vld [vmem:[#allocation30_spill] sm:$0xff] }
 0x11f   : > { %5027 = vmatmul.mubr.msk.f32.vlgmr.msra.gmra.mrb[16].mxu1 %vm264_vm1, %v7147_v11  ;;  %5227 = vmatmul.mubr.msk.f32.gmra.mrb[16].mxu0 %vm264_vm1, %v6193_v63 }
 0x120   : > { %5029 = vmatprep.mubr.msk.f32.mxu1 %vm264_vm1, %v7149_v13  ;;  %5229 = vmatprep.mubr.msk.f32.mxu0 %vm264_vm1, %v6201_v2 }
 0x123   : > { %5030 = vmatmul.mubr.msk.f32.gmra.mrb[18].mxu1 %vm264_vm1, %v7151_v15  ;;  %5230 = vmatmul.mubr.msk.f32.gmra.mrb[18].mxu0 %vm264_vm1, %v6217_v4 }
 0x124   : > { %5032 = vmatprep.mubr.msk.f32.mxu1 %vm264_vm1, %v7153_v17  ;;  %5232 = vmatprep.mubr.msk.f32.mxu0 %vm264_vm1, %v6223_v6 }
 0x127   : > { %5033 = vmatmul.mubr.msk.f32.gmra.mrb[20].mxu1 %vm264_vm1, %v7155_v19  ;;  %5233 = vmatmul.mubr.msk.f32.gmra.mrb[20].mxu0 %vm264_vm1, %v6237_v9 }
 0x128   : > { %5035 = vmatprep.mubr.msk.f32.mxu1 %vm264_vm1, %v7157_v21  ;;  %5235 = vmatprep.mubr.msk.f32.mxu0 %vm264_vm1, %v6243_v55 }
 0x12b   : > { %5036 = vmatmul.mubr.msk.f32.gmra.mrb[22].mxu1 %vm264_vm1, %v7159_v22  ;;  %5236 = vmatmul.mubr.msk.f32.gmra.mrb[22].mxu0 %vm264_vm1, %v6257_v53 }
 0x12c   : > { %5038 = vmatprep.mubr.msk.f32.mxu1 %vm264_vm1, %v7161_v37  ;;  %5238 = vmatprep.mubr.msk.f32.mxu0 %vm264_vm1, %v6263_v49 }
 0x12f   : > { %5039 = vmatmul.mubr.msk.f32.gmra.mrb[24].mxu1 %vm264_vm1, %v7163_v33  ;;  %5239 = vmatmul.mubr.msk.f32.gmra.mrb[24].mxu0 %vm264_vm1, %v6277_v45 }
 0x130   : > { %5041 = vmatprep.mubr.msk.f32.mxu1 %vm264_vm1, %v7165_v12  ;;  %5241 = vmatprep.mubr.msk.f32.mxu0 %vm264_vm1, %v6283_v41 }
 0x133   : > { %5042 = vmatmul.mubr.msk.f32.gmra.mrb[26].mxu1 %vm264_vm1, %v7167_v16  ;;  %5242 = vmatmul.mubr.msk.f32.gmra.mrb[26].mxu0 %vm264_vm1, %v7175_v26 }
 0x134   : > { %5044 = vmatprep.mubr.msk.f32.mxu1 %vm264_vm1, %v7169_v20  ;;  %5244 = vmatprep.mubr.msk.f32.mxu0 %vm264_vm1, %v7176_v27 }
 0x137   : > { %5045 = vmatmul.mubr.msk.f32.gmra.mrb[28].mxu1 %vm264_vm1, %v7177_v30  ;;  %5245 = vmatmul.mubr.msk.f32.gmra.mrb[28].mxu0 %vm264_vm1, %v7178_v31 }
 0x138   : > { %5047 = vmatprep.mubr.msk.f32.mxu1 %vm264_vm1, %v6631_v1  ;;  %5247 = vmatprep.mubr.msk.f32.mxu0 %vm264_vm1, %v4461_v29 }
 0x13b   : > { %5048 = vmatmul.mubr.msk.f32.gmra.mrb[30].mxu1 %vm264_vm1, %v6642_v14  ;;  %5248 = vmatmul.mubr.msk.f32.gmra.mrb[30].mxu0 %vm264_vm1, %v4462_v32 }
 0x1b2   : > { %v4954_v34 = vpop.f32.mrb[0].mxu1 }
 0x1b3   : > { %v1502_v35 = vpop.f32.mrb[1].mxu1 }
 0x1b6   : > { %v4957_v36 = vpop.f32.mrb[2].mxu1 }
 0x1b7   : > { %v1512_v38 = vpop.f32.mrb[3].mxu1 }
 0x1ba   : > { %v4960_v39 = vpop.f32.mrb[4].mxu1 }
 0x1bb   : > { %v1522_v40 = vpop.f32.mrb[5].mxu1 }
 0x1be   : > { %v4963_v41 = vpop.f32.mrb[6].mxu1 }
 0x1bf   : > { %v1532_v42 = vpop.f32.mrb[7].mxu1 }
 0x1c2   : > { %v4966_v43 = vpop.f32.mrb[8].mxu1 }
 0x1c3   : > { %v1542_v44 = vpop.f32.mrb[9].mxu1 }
 0x1c6   : > { %v6784_v45 = vpop.f32.mrb[10].mxu1 }
 0x1c7   : > { %v6786_v46 = vpop.f32.mrb[11].mxu1 }
 0x1ca   : > { %v6788_v47 = vpop.f32.mrb[12].mxu1 }
 0x1cb   : > { %v6790_v48 = vpop.f32.mrb[13].mxu1 }
 0x1ce   : > { %v6792_v49 = vpop.f32.mrb[14].mxu1 }
 0x1cf   : > { %v6794_v50 = vpop.f32.mrb[15].mxu1 }
 0x1d2   : > { %v5204_v51 = vpop.f32.mrb[0].mxu0 }
 0x1d3   : > { %v5252_v53 = vadd.f32 %v5204_v51, %v4954_v34  ;;  %v3448_v54 = vpop.f32.mrb[1].mxu0 }
 0x1d4   : > { %v5253_v56 = vadd.f32 %v3448_v54, %v1502_v35 }
 0x1d5   : > { %v6802_v58 = vadd.f32 %v5252_v53, %v6799_v52 }
 0x1d6   : > { %v6805_v59 = vadd.f32 %v5253_v56, %v6799_v52  ;;  %v5207_v60 = vpop.f32.mrb[2].mxu0 }
 0x1d7   : > { %v3679_v62 = vsub.f32 0.0, %v6802_v58  ;;  %v5254_v63 = vadd.f32 %v5207_v60, %v4957_v36  ;;  %v3458_v0 = vpop.f32.mrb[3].mxu0 }
 0x1d8   : > { %v3678_v2 = vsub.f32 0.0, %v6805_v59  ;;  %v5255_v4 = vadd.f32 %v3458_v0, %v1512_v38 }
 0x1d9   : > { %v3712_v5 = vmul.f32 1.442695, %v3679_v62  ;;  %v6810_v6 = vadd.f32 %v5254_v63, %v6799_v52 }
 0x1da   : > { %v3710_v7 = vmul.f32 1.442695, %v3678_v2  ;;  %v6813_v9 = vadd.f32 %v5255_v4, %v6799_v52  ;;  %v5210_v10 = vpop.f32.mrb[4].mxu0 }
 0x1db   : > { %5566 = vpow2.f32 %v3712_v5  ;;  %v3681_v55 = vsub.f32 0.0, %v6810_v6  ;;  %v5256_v57 = vadd.f32 %v5210_v10, %v4960_v39  ;;  %v3468_v28 = vpop.f32.mrb[5].mxu0 }
 0x1dc   : > { %5568 = vpow2.f32 %v3710_v7  ;;  %v3680_v24 = vsub.f32 0.0, %v6813_v9  ;;  %v5257_v25 = vadd.f32 %v3468_v28, %v1522_v40 }
 0x1dd   : > { %v3716_v8 = vmul.f32 1.442695, %v3681_v55  ;;  %v6818_v11 = vadd.f32 %v5256_v57, %v6799_v52 }
 0x1de   : > { %v3714_v13 = vmul.f32 1.442695, %v3680_v24  ;;  %v6821_v15 = vadd.f32 %v5257_v25, %v6799_v52  ;;  %v5213_v17 = vpop.f32.mrb[6].mxu0 }
 0x1df   : > { %5570 = vpow2.f32 %v3716_v8  ;;  %v3683_v19 = vsub.f32 0.0, %v6818_v11  ;;  %v5258_v21 = vadd.f32 %v5213_v17, %v4963_v41  ;;  %v3478_v22 = vpop.f32.mrb[7].mxu0 }
 0x1e0   : > { %5572 = vpow2.f32 %v3714_v13  ;;  %v3682_v37 = vsub.f32 0.0, %v6821_v15  ;;  %v5259_v33 = vadd.f32 %v3478_v22, %v1532_v42 }
 0x1e1   : > { %v3720_v12 = vmul.f32 1.442695, %v3683_v19  ;;  %v6826_v16 = vadd.f32 %v5258_v21, %v6799_v52 }
 0x1e2   : > { %v3718_v20 = vmul.f32 1.442695, %v3682_v37  ;;  %v6829_v1 = vadd.f32 %v5259_v33, %v6799_v52  ;;  %v5216_v3 = vpop.f32.mrb[8].mxu0 }
 0x1e3   : > { %5574 = vpow2.f32 %v3720_v12  ;;  %v3685_v61 = vsub.f32 0.0, %v6826_v16  ;;  %v5260_v14 = vadd.f32 %v5216_v3, %v4966_v43  ;;  %v3488_v18 = vpop.f32.mrb[9].mxu0 }
 0x1e4   : > { %5576 = vpow2.f32 %v3718_v20  ;;  %v3684_v23 = vsub.f32 0.0, %v6829_v1  ;;  %v5261_v26 = vadd.f32 %v3488_v18, %v1542_v44 }
 0x1e5   : > { %v5567_v27 = vpop.eup %5566  ;;  %v3724_v29 = vmul.f32 1.442695, %v3685_v61  ;;  %v6834_v30 = vadd.f32 %v5260_v14, %v6799_v52 }
 0x1e6   : > { %v5569_v31 = vpop.eup %5568  ;;  %v3775_v32 = vadd.f32 1.0, %v5567_v27  ;;  %v3722_v34 = vmul.f32 1.442695, %v3684_v23  ;;  %v6837_v35 = vadd.f32 %v5261_v26, %v6799_v52  ;;  %v5219_v36 = vpop.f32.mrb[10].mxu0 }
 0x1e7   : > { %v3774_v38 = vadd.f32 1.0, %v5569_v31  ;;  %5578 = vpow2.f32 %v3724_v29  ;;  %v3687_v39 = vsub.f32 0.0, %v6834_v30  ;;  %v5262_v40 = vadd.f32 %v5219_v36, %v6784_v45  ;;  %v3498_v41 = vpop.f32.mrb[11].mxu0 }
 0x1e8   : > { %5580 = vrcp.f32 %v3775_v32  ;;  %v3686_v42 = vsub.f32 0.0, %v6837_v35  ;;  %v5263_v43 = vadd.f32 %v3498_v41, %v6786_v46 }
 0x1e9   : > { %v5571_v44 = vpop.eup %5570  ;;  %5582 = vrcp.f32 %v3774_v38  ;;  %v3728_v51 = vmul.f32 1.442695, %v3687_v39  ;;  %v6844_v53 = vadd.f32 %v5262_v40, %v6799_v52 }
 0x1ea   : > { %v5573_v54 = vpop.eup %5572  ;;  %v3777_v56 = vadd.f32 1.0, %v5571_v44  ;;  %5584 = vpow2.f32 %v3722_v34  ;;  %v3726_v60 = vmul.f32 1.442695, %v3686_v42  ;;  %v6847_v62 = vadd.f32 %v5263_v43, %v6799_v52  ;;  %v5222_v45 = vpop.f32.mrb[12].mxu0 }
 0x1eb   : > { %v3776_v63 = vadd.f32 1.0, %v5573_v54  ;;  %5586 = vpow2.f32 %v3728_v51  ;;  %v3689_v0 = vsub.f32 0.0, %v6844_v53  ;;  %v5264_v46 = vadd.f32 %v5222_v45, %v6788_v47  ;;  %v3508_v2 = vpop.f32.mrb[13].mxu0 }
 0x1ec   : > { %5588 = vrcp.f32 %v3777_v56  ;;  %v3688_v4 = vsub.f32 0.0, %v6847_v62  ;;  %v5265_v5 = vadd.f32 %v3508_v2, %v6790_v48 }
 0x1ed   : > { %v5575_v7 = vpop.eup %5574  ;;  %5590 = vrcp.f32 %v3776_v63  ;;  %v3732_v10 = vmul.f32 1.442695, %v3689_v0  ;;  %v6855_v55 = vadd.f32 %v5264_v46, %v6799_v52 }
 0x1ee   : > { %v5577_v57 = vpop.eup %5576  ;;  %v3779_v28 = vadd.f32 1.0, %v5575_v7  ;;  %5592 = vpow2.f32 %v3726_v60  ;;  %v3730_v24 = vmul.f32 1.442695, %v3688_v4  ;;  %v6858_v47 = vadd.f32 %v5265_v5, %v6799_v52  ;;  %v5225_v25 = vpop.f32.mrb[14].mxu0 }
 0x1ef   : > { %v3778_v8 = vadd.f32 1.0, %v5577_v57  ;;  %5594 = vpow2.f32 %v3732_v10  ;;  %v3691_v48 = vsub.f32 0.0, %v6855_v55  ;;  %v5266_v13 = vadd.f32 %v5225_v25, %v6792_v49  ;;  %v3518_v17 = vpop.f32.mrb[15].mxu0 }
 0x1f0   : > { %5596 = vrcp.f32 %v3779_v28  ;;  %v3690_v19 = vsub.f32 0.0, %v6858_v47  ;;  %v5267_v21 = vadd.f32 %v3518_v17, %v6794_v50 }
 0x1f1   : > { %v5579_v22 = vpop.eup %5578  ;;  %5598 = vrcp.f32 %v3778_v8  ;;  %v3736_v37 = vmul.f32 1.442695, %v3691_v48  ;;  %v6869_v33 = vadd.f32 %v5266_v13, %v6799_v52 }
 0x1f2   : > { %v5581_v12 = vpop.eup %5580  ;;  %v3781_v20 = vadd.f32 1.0, %v5579_v22  ;;  %5600 = vpow2.f32 %v3730_v24  ;;  %v3734_v3 = vmul.f32 1.442695, %v3690_v19  ;;  %v6872_v61 = vadd.f32 %v5267_v21, %v6799_v52  ;;  %v5028_v49 = vpop.f32.mrb[16].mxu1 }
 0x1f3   : > { %v5228_v14 = vpop.f32.mrb[16].mxu0  ;;  %v5583_v18 = vpop.eup %5582  ;;  %v3839_v23 = vmul.f32 %v5581_v12, %v6802_v58  ;;  %5602 = vpow2.f32 %v3736_v37  ;;  %v3693_v50 = vsub.f32 0.0, %v6869_v33 }
 0x1f4   : > { %v5268_v26 = vadd.f32 %v5228_v14, %v5028_v49  ;;  %v1971_v27 = vpop.f32.mrb[17].mxu1  ;;  %v3528_v29 = vpop.f32.mrb[17].mxu0  ;;  %v3838_v32 = vmul.f32 %v5583_v18, %v6805_v59  ;;  %5604 = vrcp.f32 %v3781_v20  ;;  %v3692_v34 = vsub.f32 0.0, %v6872_v61 }
 0x1f5   : > { %v5585_v31 = vpop.eup %5584  ;;  %v5269_v36 = vadd.f32 %v3528_v29, %v1971_v27  ;;  %3871 = vst [vmem:[%s6879_s9 + $0x8] sm:$0xff] %v3839_v23  ;;  %5606 = vpow2.f32 %v3734_v3  ;;  %v3740_v39 = vmul.f32 1.442695, %v3693_v50 }
 0x1f6   : > { %v5587_v38 = vpop.eup %5586  ;;  %v3780_v58 = vadd.f32 1.0, %v5585_v31  ;;  %v6883_v40 = vadd.f32 %v5268_v26, %v6799_v52  ;;  %3870 = vst [vmem:[%s6879_s9] sm:$0xff] %v3838_v32  ;;  %v3738_v59 = vmul.f32 1.442695, %v3692_v34  ;;  %v5031_v44 = vpop.f32.mrb[18].mxu1 }
 0x1f7   : > { %v5589_v41 = vpop.eup %5588  ;;  %v3783_v42 = vadd.f32 1.0, %v5587_v38  ;;  %v6887_v43 = vadd.f32 %v5269_v36, %v6799_v52  ;;  %v5231_v51 = vpop.f32.mrb[18].mxu0 }
 0x1f8   : > { %v5591_v54 = vpop.eup %5590  ;;  %v3841_v56 = vmul.f32 %v5589_v41, %v6810_v6  ;;  %5608 = vrcp.f32 %v3780_v58  ;;  %v3695_v60 = vsub.f32 0.0, %v6883_v40  ;;  %v5270_v45 = vadd.f32 %v5231_v51, %v5031_v44  ;;  %v1981_v63 = vpop.f32.mrb[19].mxu1 }
 0x1f9   : > { %v3538_v0 = vpop.f32.mrb[19].mxu0  ;;  %v5593_v46 = vpop.eup %5592  ;;  %v3840_v2 = vmul.f32 %v5591_v54, %v6813_v9  ;;  %5610 = vrcp.f32 %v3783_v42  ;;  %v3694_v4 = vsub.f32 0.0, %v6887_v43 }
 0x1fa   : > { %v5271_v5 = vadd.f32 %v3538_v0, %v1981_v63  ;;  %v5595_v7 = vpop.eup %5594  ;;  %3873 = vst [vmem:[%s6879_s9 + $0x18] sm:$0xff] %v3841_v56  ;;  %v3782_v10 = vadd.f32 1.0, %v5593_v46  ;;  %5612 = vpow2.f32 %v3740_v39  ;;  %v3744_v57 = vmul.f32 1.442695, %v3695_v60  ;;  %v5034_v9 = vpop.f32.mrb[20].mxu1 }
 0x1fb   : > { %v6895_v6 = vadd.f32 %v5270_v45, %v6799_v52  ;;  %v5597_v28 = vpop.eup %5596  ;;  %3872 = vst [vmem:[%s6879_s9 + $0x10] sm:$0xff] %v3840_v2  ;;  %v3785_v24 = vadd.f32 1.0, %v5595_v7  ;;  %5614 = vpow2.f32 %v3738_v59  ;;  %v3742_v25 = vmul.f32 1.442695, %v3694_v4  ;;  %v5234_v48 = vpop.f32.mrb[20].mxu0 }
 0x1fc   : > { %v6899_v8 = vadd.f32 %v5271_v5, %v6799_v52  ;;  %v5599_v13 = vpop.eup %5598  ;;  %v3843_v17 = vmul.f32 %v5597_v28, %v6818_v11  ;;  %5616 = vrcp.f32 %v3782_v10  ;;  %v5272_v21 = vadd.f32 %v5234_v48, %v5034_v9  ;;  %v1991_v22 = vpop.f32.mrb[21].mxu1 }
 0x1fd   : > { %v3697_v19 = vsub.f32 0.0, %v6895_v6  ;;  %v3548_v37 = vpop.f32.mrb[21].mxu0  ;;  %v5601_v12 = vpop.eup %5600  ;;  %v3842_v20 = vmul.f32 %v5599_v13, %v6821_v15  ;;  %5618 = vrcp.f32 %v3785_v24 }
 0x1fe   : > { %v3696_v3 = vsub.f32 0.0, %v6899_v8  ;;  %v5273_v49 = vadd.f32 %v3548_v37, %v1991_v22  ;;  %v5603_v14 = vpop.eup %5602  ;;  %3875 = vst [vmem:[%s6879_s9 + $0x28] sm:$0xff] %v3843_v17  ;;  %v3784_v18 = vadd.f32 1.0, %v5601_v12  ;;  %5620 = vpow2.f32 %v3744_v57  ;;  %v5037_v29 = vpop.f32.mrb[22].mxu1 }
 0x1ff   : > { %v3748_v23 = vmul.f32 1.442695, %v3697_v19  ;;  %v6907_v11 = vadd.f32 %v5272_v21, %v6799_v52  ;;  %v5605_v50 = vpop.eup %5604  ;;  %3874 = vst [vmem:[%s6879_s9 + $0x20] sm:$0xff] %v3842_v20  ;;  %v3787_v26 = vadd.f32 1.0, %v5603_v14  ;;  %5622 = vpow2.f32 %v3742_v25  ;;  %v5237_v31 = vpop.f32.mrb[22].mxu0 }
 0x200   : > { %v3746_v27 = vmul.f32 1.442695, %v3696_v3  ;;  %v6911_v15 = vadd.f32 %v5273_v49, %v6799_v52  ;;  %v5607_v32 = vpop.eup %5606  ;;  %v3845_v34 = vmul.f32 %v5605_v50, %v6826_v16  ;;  %5624 = vrcp.f32 %v3784_v18  ;;  %v2001_v58 = vpop.f32.mrb[23].mxu1 }
 0x201   : > { %v3699_v36 = vsub.f32 0.0, %v6907_v11  ;;  %v5274_v38 = vadd.f32 %v5237_v31, %v5037_v29  ;;  %v3558_v39 = vpop.f32.mrb[23].mxu0  ;;  %5626 = vrcp.f32 %v3787_v26  ;;  %v3786_v41 = vadd.f32 1.0, %v5607_v32 }
 0x202   : > { %v3698_v42 = vsub.f32 0.0, %v6911_v15  ;;  %v5275_v59 = vadd.f32 %v3558_v39, %v2001_v58  ;;  %v5609_v44 = vpop.eup %5608  ;;  %3877 = vst [vmem:[%s6879_s9 + $0x38] sm:$0xff] %v3845_v34  ;;  %5628 = vpow2.f32 %v3748_v23  ;;  %v5040_v63 = vpop.f32.mrb[24].mxu1 }
 0x203   : > { %v3752_v51 = vmul.f32 1.442695, %v3699_v36  ;;  %v6918_v54 = vadd.f32 %v5274_v38, %v6799_v52  ;;  %v5611_v16 = vpop.eup %5610  ;;  %v3844_v56 = vmul.f32 %v5609_v44, %v6829_v1  ;;  %5630 = vrcp.f32 %v3786_v41  ;;  %v5240_v0 = vpop.f32.mrb[24].mxu0 }
 0x204   : > { %v3750_v60 = vmul.f32 1.442695, %v3698_v42  ;;  %v6922_v45 = vadd.f32 %v5275_v59, %v6799_v52  ;;  %v5613_v46 = vpop.eup %5612  ;;  %v3847_v2 = vmul.f32 %v5611_v16, %v6834_v30  ;;  %5632 = vpow2.f32 %v3746_v27  ;;  %v2011_v7 = vpop.f32.mrb[25].mxu1 }
 0x205   : > { %v3701_v4 = vsub.f32 0.0, %v6918_v54  ;;  %v5276_v5 = vadd.f32 %v5240_v0, %v5040_v63  ;;  %v3568_v10 = vpop.f32.mrb[25].mxu0  ;;  %v5615_v57 = vpop.eup %5614  ;;  %3876 = vst [vmem:[%s6879_s9 + $0x30] sm:$0xff] %v3844_v56  ;;  %v3789_v1 = vadd.f32 1.0, %v5613_v46  ;;  %5634 = vpow2.f32 %v3752_v51 }
 0x206   : > { %v3700_v28 = vsub.f32 0.0, %v6922_v45  ;;  %v5277_v24 = vadd.f32 %v3568_v10, %v2011_v7  ;;  %v5617_v25 = vpop.eup %5616  ;;  %3879 = vst [vmem:[%s6879_s9 + $0x48] sm:$0xff] %v3847_v2  ;;  %v3788_v9 = vadd.f32 1.0, %v5615_v57  ;;  %5636 = vpow2.f32 %v3750_v60  ;;  %v5043_v22 = vpop.f32.mrb[26].mxu1 }
 0x207   : > { %v3756_v48 = vmul.f32 1.442695, %v3701_v4  ;;  %v6930_v30 = vadd.f32 %v5276_v5, %v6799_v52  ;;  %v5619_v13 = vpop.eup %5618  ;;  %v3846_v17 = vmul.f32 %v5617_v25, %v6837_v35  ;;  %5638 = vrcp.f32 %v3789_v1  ;;  %v5243_v37 = vpop.f32.mrb[26].mxu0 }
 0x208   : > { %v3754_v19 = vmul.f32 1.442695, %v3700_v28  ;;  %v6934_v21 = vadd.f32 %v5277_v24, %v6799_v52  ;;  %v5621_v12 = vpop.eup %5620  ;;  %v3849_v20 = vmul.f32 %v5619_v13, %v6844_v53  ;;  %5640 = vrcp.f32 %v3788_v9  ;;  %v2021_v14 = vpop.f32.mrb[27].mxu1 }
 0x209   : > { %v3703_v3 = vsub.f32 0.0, %v6930_v30  ;;  %v5278_v49 = vadd.f32 %v5243_v37, %v5043_v22  ;;  %v3578_v18 = vpop.f32.mrb[27].mxu0  ;;  %v5623_v23 = vpop.eup %5622  ;;  %3878 = vst [vmem:[%s6879_s9 + $0x40] sm:$0xff] %v3846_v17  ;;  %v3791_v35 = vadd.f32 1.0, %v5621_v12  ;;  %5642 = vpow2.f32 %v3756_v48 }
 0x20a   : > { %v3702_v50 = vsub.f32 0.0, %v6934_v21  ;;  %v5279_v26 = vadd.f32 %v3578_v18, %v2021_v14  ;;  %v5625_v27 = vpop.eup %5624  ;;  %3881 = vst [vmem:[%s6879_s9 + $0x58] sm:$0xff] %v3849_v20  ;;  %v3790_v29 = vadd.f32 1.0, %v5623_v23  ;;  %5644 = vpow2.f32 %v3754_v19  ;;  %v5046_v58 = vpop.f32.mrb[28].mxu1 }
 0x20b   : > { %v3760_v31 = vmul.f32 1.442695, %v3703_v3  ;;  %v6942_v53 = vadd.f32 %v5278_v49, %v6799_v52  ;;  %v5627_v32 = vpop.eup %5626  ;;  %v3848_v34 = vmul.f32 %v5625_v27, %v6847_v62  ;;  %5646 = vrcp.f32 %v3791_v35  ;;  %v5246_v39 = vpop.f32.mrb[28].mxu0 }
 0x20c   : > { %v3758_v36 = vmul.f32 1.442695, %v3702_v50  ;;  %v6946_v38 = vadd.f32 %v5279_v26, %v6799_v52  ;;  %v5629_v41 = vpop.eup %5628  ;;  %v3851_v42 = vmul.f32 %v5627_v32, %v6855_v55  ;;  %5648 = vrcp.f32 %v3790_v29  ;;  %v2031_v51 = vpop.f32.mrb[29].mxu1 }
 0x20d   : > { %v3705_v59 = vsub.f32 0.0, %v6942_v53  ;;  %v5280_v44 = vadd.f32 %v5246_v39, %v5046_v58  ;;  %v3588_v16 = vpop.f32.mrb[29].mxu0  ;;  %v5631_v56 = vpop.eup %5630  ;;  %3880 = vst [vmem:[%s6879_s9 + $0x50] sm:$0xff] %v3848_v34  ;;  %v3793_v62 = vadd.f32 1.0, %v5629_v41  ;;  %5650 = vpow2.f32 %v3760_v31 }
 0x20e   : > { %v3704_v60 = vsub.f32 0.0, %v6946_v38  ;;  %v5281_v63 = vadd.f32 %v3588_v16, %v2031_v51  ;;  %v5633_v0 = vpop.eup %5632  ;;  %3883 = vst [vmem:[%s6879_s9 + $0x68] sm:$0xff] %v3851_v42  ;;  %v3850_v46 = vmul.f32 %v5631_v56, %v6858_v47  ;;  %5652 = vpow2.f32 %v3758_v36  ;;  %v5049_v57 = vpop.f32.mrb[30].mxu1 }
 0x20f   : > { %v3764_v55 = vmul.f32 1.442695, %v3705_v59  ;;  %v6955_v2 = vadd.f32 %v5280_v44, %v6799_v52  ;;  %v5635_v4 = vpop.eup %5634  ;;  %5654 = vrcp.f32 %v3793_v62  ;;  %v3792_v5 = vadd.f32 1.0, %v5633_v0  ;;  %v5249_v1 = vpop.f32.mrb[30].mxu0 }
 0x210   : > { %v3762_v7 = vmul.f32 1.442695, %v3704_v60  ;;  %v6958_v10 = vadd.f32 %v5281_v63, %v6799_v52  ;;  %v5637_v28 = vpop.eup %5636  ;;  %3882 = vst [vmem:[%s6879_s9 + $0x60] sm:$0xff] %v3850_v46  ;;  %v3795_v24 = vadd.f32 1.0, %v5635_v4  ;;  %v5282_v25 = vadd.f32 %v5249_v1, %v5049_v57  ;;  %v2041_v9 = vpop.f32.mrb[31].mxu1 }
 0x211   : > { %5656 = vpow2.f32 %v3764_v55  ;;  %v3707_v47 = vsub.f32 0.0, %v6955_v2  ;;  %v3598_v48 = vpop.f32.mrb[31].mxu0  ;;  %v5639_v13 = vpop.eup %5638  ;;  %v3794_v17 = vadd.f32 1.0, %v5637_v28 }
 0x212   : > { %5658 = vrcp.f32 %v3792_v5  ;;  %v3706_v19 = vsub.f32 0.0, %v6958_v10  ;;  %v5283_v22 = vadd.f32 %v3598_v48, %v2041_v9  ;;  %v5641_v37 = vpop.eup %5640  ;;  %v3853_v12 = vmul.f32 %v5639_v13, %v6869_v33 }
 0x213   : > { %5660 = vrcp.f32 %v3795_v24  ;;  %v3768_v20 = vmul.f32 1.442695, %v3707_v47  ;;  %v6965_v3 = vadd.f32 %v5282_v25, %v6799_v52  ;;  %v5643_v49 = vpop.eup %5642  ;;  %v3852_v14 = vmul.f32 %v5641_v37, %v6872_v61 }
 0x214   : > { %5662 = vrcp.f32 %v3794_v17  ;;  %v6969_v18 = vadd.f32 %v5283_v22, %v6799_v52  ;;  %v5645_v23 = vpop.eup %5644  ;;  %3885 = vst [vmem:[%s6879_s9 + $0x78] sm:$0xff] %v3853_v12  ;;  %v3797_v35 = vadd.f32 1.0, %v5643_v49  ;;  %v3766_v50 = vmul.f32 1.442695, %v3706_v19 }
 0x215   : > { %5664 = vpow2.f32 %v3762_v7  ;;  %v3709_v33 = vsub.f32 0.0, %v6965_v3  ;;  %v5647_v26 = vpop.eup %5646  ;;  %3884 = vst [vmem:[%s6879_s9 + $0x70] sm:$0xff] %v3852_v14  ;;  %v3796_v27 = vadd.f32 1.0, %v5645_v23 }
 0x216   : > { %5666 = vpow2.f32 %v3768_v20  ;;  %v3708_v29 = vsub.f32 0.0, %v6969_v18  ;;  %v5649_v61 = vpop.eup %5648  ;;  %v3855_v31 = vmul.f32 %v5647_v26, %v6883_v40 }
 0x217   : > { %5668 = vrcp.f32 %v3797_v35  ;;  %v3772_v52 = vmul.f32 1.442695, %v3709_v33  ;;  %v5651_v32 = vpop.eup %5650  ;;  %v3854_v34 = vmul.f32 %v5649_v61, %v6887_v43 }
 0x218   : > { %5670 = vrcp.f32 %v3796_v27  ;;  %v5653_v36 = vpop.eup %5652  ;;  %3887 = vst [vmem:[%s6879_s9 + $0x88] sm:$0xff] %v3855_v31  ;;  %v3799_v58 = vadd.f32 1.0, %v5651_v32  ;;  %v3770_v39 = vmul.f32 1.442695, %v3708_v29 }
 0x219   : > { %5672 = vpow2.f32 %v3766_v50  ;;  %v5655_v41 = vpop.eup %5654  ;;  %3886 = vst [vmem:[%s6879_s9 + $0x80] sm:$0xff] %v3854_v34  ;;  %v3798_v42 = vadd.f32 1.0, %v5653_v36 }
 0x21a   : > { %5674 = vpow2.f32 %v3772_v52  ;;  %v3857_v40 = vmul.f32 %v5655_v41, %v6895_v6 }
 0x21b   : > { %v5657_v59 = vpop.eup %5656  ;;  %5676 = vrcp.f32 %v3799_v58 }
 0x21c   : > { %v5659_v44 = vpop.eup %5658  ;;  %5678 = vrcp.f32 %v3798_v42  ;;  %v3801_v43 = vadd.f32 1.0, %v5657_v59  ;;  %3889 = vst [vmem:[%s6879_s9 + $0x98] sm:$0xff] %v3857_v40 }
 0x21d   : > { %v5661_v51 = vpop.eup %5660  ;;  %v3856_v16 = vmul.f32 %v5659_v44, %v6899_v8  ;;  %5680 = vpow2.f32 %v3770_v39 }
 0x21e   : > { %v5663_v56 = vpop.eup %5662  ;;  %v3859_v62 = vmul.f32 %v5661_v51, %v6907_v11  ;;  %5682 = vrcp.f32 %v3801_v43 }
 0x21f   : > { %v5665_v60 = vpop.eup %5664  ;;  %3888 = vst [vmem:[%s6879_s9 + $0x90] sm:$0xff] %v3856_v16  ;;  %v3858_v6 = vmul.f32 %v5663_v56, %v6911_v15 }
 0x220   : > { %v5667_v63 = vpop.eup %5666  ;;  %3891 = vst [vmem:[%s6879_s9 + $0xa8] sm:$0xff] %v3859_v62  ;;  %v3800_v0 = vadd.f32 1.0, %v5665_v60 }
 0x221   : > { %v5669_v46 = vpop.eup %5668  ;;  %3890 = vst [vmem:[%s6879_s9 + $0xa0] sm:$0xff] %v3858_v6  ;;  %v3803_v55 = vadd.f32 1.0, %v5667_v63 }
 0x222   : > { %v5671_v4 = vpop.eup %5670  ;;  %v3861_v8 = vmul.f32 %v5669_v46, %v6918_v54  ;;  %5684 = vrcp.f32 %v3800_v0 }
 0x223   : > { %v5673_v5 = vpop.eup %5672  ;;  %v3860_v11 = vmul.f32 %v5671_v4, %v6922_v45  ;;  %5686 = vrcp.f32 %v3803_v55 }
 0x224   : > { %v5675_v7 = vpop.eup %5674  ;;  %3893 = vst [vmem:[%s6879_s9 + $0xb8] sm:$0xff] %v3861_v8  ;;  %v3802_v15 = vadd.f32 1.0, %v5673_v5 }
 0x225   : > { %v5677_v57 = vpop.eup %5676  ;;  %3892 = vst [vmem:[%s6879_s9 + $0xb0] sm:$0xff] %v3860_v11  ;;  %v3805_v1 = vadd.f32 1.0, %v5675_v7 }
 0x226   : > { %v5679_v28 = vpop.eup %5678  ;;  %v3863_v24 = vmul.f32 %v5677_v57, %v6930_v30  ;;  %5688 = vrcp.f32 %v3802_v15 }
 0x227   : > { %v5681_v54 = vpop.eup %5680  ;;  %v3862_v47 = vmul.f32 %v5679_v28, %v6934_v21  ;;  %5690 = vrcp.f32 %v3805_v1 }
 0x228   : > { %v5683_v45 = vpop.eup %5682  ;;  %3895 = vst [vmem:[%s6879_s9 + $0xc8] sm:$0xff] %v3863_v24  ;;  %v3804_v25 = vadd.f32 1.0, %v5681_v54 }
 0x229   : > { %3894 = vst [vmem:[%s6879_s9 + $0xc0] sm:$0xff] %v3862_v47  ;;  %v3865_v9 = vmul.f32 %v5683_v45, %v6942_v53 }
 0x22a   : > { %5692 = vrcp.f32 %v3804_v25 }
 0x22b   : > { %3897 = vst [vmem:[%s6879_s9 + $0xd8] sm:$0xff] %v3865_v9 }
 0x22c   : > { %v5685_v30 = vpop.eup %5684 }
 0x22d   : > { %v5687_v48 = vpop.eup %5686  ;;  %v3864_v13 = vmul.f32 %v5685_v30, %v6946_v38 }
 0x22e   : > { %v3867_v21 = vmul.f32 %v5687_v48, %v6955_v2 }
 0x22f   : > { %3896 = vst [vmem:[%s6879_s9 + $0xd0] sm:$0xff] %v3864_v13 }
 0x230   : > { %v5689_v17 = vpop.eup %5688  ;;  %3899 = vst [vmem:[%s6879_s9 + $0xe8] sm:$0xff] %v3867_v21 }
 0x231   : > { %v5691_v19 = vpop.eup %5690  ;;  %v3866_v22 = vmul.f32 %v5689_v17, %v6958_v10 }
 0x232   : > { %v3869_v53 = vmul.f32 %v5691_v19, %v6965_v3 }
 0x233   : > { %3898 = vst [vmem:[%s6879_s9 + $0xe0] sm:$0xff] %v3866_v22 }
 0x234   : > { %v5693_v37 = vpop.eup %5692  ;;  %3901 = vst [vmem:[%s6879_s9 + $0xf8] sm:$0xff] %v3869_v53 }
 0x235   : > { %v3868_v38 = vmul.f32 %v5693_v37, %v6969_v18 }
 0x237   : > { %3900 = vst [vmem:[%s6879_s9 + $0xf0] sm:$0xff] %v3868_v38 }
 0x238   : > { %5707 = shalt.err (!%p5704_p5)
}
 0x239   : > { %s5708_s29 = scalar_lea.hbm %s7010_s21, 4096  ;;  %s5712_s5 = scalar_lea.hbm %s7067_s3, 8192 }
 0x23a   : > { %p5709_p6 = scmp.ne.s32.totalorder %s7010_s21, %s5708_s29  ;;  %p5713_p10 = scmp.lt.u32.totalorder %s7010_s21, %s7067_s3 }
 0x23b   : > { %p5714_p11 = scmp.lt.u32.totalorder %s5712_s5, %s5708_s29  ;;  %p5716_p13 = scmp.lt.u32.totalorder %s5708_s29, %s7010_s21 }
 0x23c   : > { %p5710_p7 = pnand %p5709_p6, %p5837_p4 }
 0x23d   : > { %p5715_p12 = por %p5714_p11, %p5713_p10 }
 0x23e   : > { %p5711_p9 = pneg %p5710_p7 }
 0x23f   : > { %p5717_p0 = por %p5716_p13, %p5715_p12 }
 0x241   : > { %p5718_p1 = pnand %p5717_p0, %p5711_p9 }
 0x243   : > { %5721 = shalt.err (!%p5718_p1)
}
 0x244   : > { %s5775_s8 = smov 128   ;;  %s5776_s9 = smov 8  }
 0x245   : > { %5509 = dma.vmem_to_hbm [thread:$0]  (%p5837_p4), %s7012_s11, 4096, %s7010_s21, %s7018_s15, %s5775_s8, %s5775_s8, %s5776_s9  }
 0x246 PF: > { %p5515_p2 = scmp.ge.s32.totalorder %s5772_s17, 2  ;;  %s3933_s10 = sand.u32 1, %s5752_s12  }
 0x247   : > { %s3934_s18 = scalar_lea.sflag [#allocation3], %s3933_s10 }
 0x248   : > { %p5512_p3 = pnand %p5515_p2, %p5844_p8 }
 0x24a   : > { %5747 = dma.done.wait (!%p5512_p3), %s3934_s18, 4096  }
 0x24b   : > { %5749 = vsyncadd (!%p5512_p3), %s3934_s18, 4294963200  ;;  %s16_s17 = sadd.s32 1, %s5772_s17   ;;  %s7179_s12 = smov %s5756_s13 }
 0x24c   : > { %p13_p5 = scmp.ge.s32.totalorder %s16_s17, 4   ;;  %s7180_s13 = smov %s5760_s14 }
 0x24d   : > { %s7181_s14 = smov %s5850_s25  ;;  %s7182_s15 = smov %s5768_s16 }
 0x24e   : > { %s7183_s16 = smov %s7185_s20  ;;  %15 = sbr.rel (!%p13_p5) target bundleno = 4 (0x4), region = 69 }
 0x255   :  { %3939 = vsyncpa [#allocation3], 1 }
 0x256   :  { %3941 = vsyncpa [#allocation3 + $0x1], 1 }

</bundles_post_ra>
